<compile_context>
chip_gen: v7x
topology: tpu7x:2x2x1
jax: 0.10.0
libtpu: 0.0.40
codegen_flags: <defaults>
</compile_context>

<pallas_src>
import functools

import jax
import jax.numpy as jnp
from jax.experimental import pallas as pl
from jax.experimental.pallas import tpu as pltpu


def _round_up(x, m):
    return (x + m - 1) // m * m


def qmix_kernel(qs_ref, st_ref, wcat_ref, bcat_ref, expand_ref, pool_ref,
                wv2_ref, bv2_ref, out_ref, *, ae_p, e_p, compute_dtype):
    f32 = jnp.float32

    # One fused hypernet GEMM: (TB, S) @ (S, AE_p + 3*E_p), f32 accumulation.
    st = st_ref[...].astype(compute_dtype)
    h = jnp.dot(st, wcat_ref[...], preferred_element_type=f32)
    h = h + bcat_ref[...]                                    # (TB, Wtot) f32

    o1, o2, o3 = ae_p, ae_p + e_p, ae_p + 2 * e_p            # 128-aligned offsets
    w1 = h[:, :o1]                                           # hyper_w_1(s)   (TB, AE_p)
    b1 = h[:, o1:o2]                                         # hyper_b_1(s)   (TB, E_p)
    wf = h[:, o2:o3]                                         # hyper_w_final  (TB, E_p)
    vh = jnp.maximum(h[:, o3:], 0.0)                         # relu(V[0](s))  (TB, E_p)

    # In-kernel expansion of raw qs (TB, A) to w1's flattened (A, E) lane
    # layout via a constant 0/1 matmul (exact in f32), then the mixing bmm is
    # an elementwise product + grouped lane-sum (another 0/1 matmul, f32 so
    # the qs*w1 products stay unrounded).
    qs_exp = jnp.dot(qs_ref[...], expand_ref[...],
                     preferred_element_type=f32)             # (TB, AE_p)
    prod = qs_exp * w1                                       # (TB, AE_p)  VPU
    hidden = jnp.dot(prod, pool_ref[...],
                     preferred_element_type=f32) + b1        # (TB, E_p)

    # ELU: single transcendental on the negative branch.
    hidden = jnp.where(hidden > 0, hidden, jnp.exp(hidden) - 1.0)

    # y = bmm(hidden, w_final) + V(s); the V head's (E,1) matmul is folded
    # into the per-row reduction, done as a ones-row contraction of z's lane
    # axis (transposed-RHS matmul) -> lane-dense (1, TB) output.
    z = hidden * wf + vh * wv2_ref[...]                      # (TB, E_p)
    ones_row = jnp.ones((1, e_p), f32)
    y = jax.lax.dot_general(ones_row, z, (((1,), (1,)), ((), ())),
                            preferred_element_type=f32)      # (1, TB)
    out_ref[...] = y + bv2_ref[0, 0]                         # SMEM scalar bias


def unconstrained_qmix_forward(agent_qs, states, params, *, n_agents_inp,
                               embed_dim, tile_b=1024,
                               compute_dtype=jnp.bfloat16):
    """agent_qs: (bs, T, A), states: (bs, T, S) -> q_tot: (bs, T, 1).

    `compute_dtype` is the MXU input dtype for the states-side hypernet GEMM
    (f32 accumulation).  Use jnp.float32 for bit-tight results.
    """
    bs = agent_qs.shape[0]
    A, E = n_agents_inp, embed_dim
    S = params["w_b1"].shape[0]
    AE = A * E
    AE_p = _round_up(AE, 128)        # w1 segment, lane padded
    E_p = _round_up(E, 128)          # b1 / w_final / V-hidden segments
    Wtot = AE_p + 3 * E_p

    qs_flat = agent_qs.reshape(-1, A).astype(jnp.float32)     # (B, A) raw
    st_flat = states.reshape(-1, S)                           # (B, S) as-is
    B = qs_flat.shape[0]

    # Big, 128-aligned batch tiles; no host-side batch padding (Pallas handles
    # the ragged last block).  Clamp so the "parallel" grid has >= 2 steps
    # whenever possible (v7x megacore).  tile_b=1024 fits comfortably in v5e's
    # 16 MiB scoped VMEM default.
    tile_b = _round_up(max(tile_b, 128), 128)
    tile_b = min(tile_b, max(128, _round_up(pl.cdiv(B, 2), 128)))
    grid = (pl.cdiv(B, tile_b),)

    def pad_cols(w, width):
        w = jnp.asarray(w, jnp.float32)
        return jnp.pad(w, ((0, 0), (0, width - w.shape[1])))

    # Fused, lane-padded hypernet weights / biases.
    w_cat = jnp.concatenate(
        [pad_cols(params["w_w1"], AE_p), pad_cols(params["w_b1"], E_p),
         pad_cols(params["w_wf"], E_p), pad_cols(params["w_v1"], E_p)],
        axis=1).astype(compute_dtype)                                 # (S, Wtot)
    b_cat = jnp.concatenate(
        [pad_cols(params["b_w1"], AE_p), pad_cols(params["b_b1"], E_p),
         pad_cols(params["b_wf"], E_p), pad_cols(params["b_v1"], E_p)],
        axis=1)                                                       # (1, Wtot) f32

    # Constant 0/1 matrices (f32, exact):
    #   expand[a, a*E + e] = 1 : qs -> flattened (A, E) layout.
    #   pool[a*E + e, e]   = 1 : grouped lane-sum over agents.
    agents = jnp.arange(A)
    cols_ae = jnp.arange(AE_p)
    expand = (((cols_ae[None, :] // E) == agents[:, None]) &
              (cols_ae[None, :] < AE)).astype(jnp.float32)            # (A, AE_p)
    rows = jnp.arange(AE_p)
    cols_e = jnp.arange(E_p)
    sum_pool = (((rows[:, None] % E) == cols_e[None, :]) &
                (rows[:, None] < AE)).astype(jnp.float32)             # (AE_p, E_p)

    w_v2_row = pad_cols(params["w_v2"].T, E_p)                        # (1, E_p) f32
    b_v2 = jnp.asarray(params["b_v2"], jnp.float32).reshape(1, 1)     # SMEM scalar

    kernel = functools.partial(qmix_kernel, ae_p=AE_p, e_p=E_p,
                               compute_dtype=compute_dtype)

    out = pl.pallas_call(
        kernel,
        out_shape=jax.ShapeDtypeStruct((1, B), jnp.float32),
        grid_spec=pltpu.PrefetchScalarGridSpec(
            num_scalar_prefetch=0,
            grid=grid,
            in_specs=[
                pl.BlockSpec((tile_b, A), lambda i: (i, 0)),      # raw agent_qs
                pl.BlockSpec((tile_b, S), lambda i: (i, 0)),      # states
                pl.BlockSpec((S, Wtot), lambda i: (0, 0)),        # fused W
                pl.BlockSpec((1, Wtot), lambda i: (0, 0)),        # fused b
                pl.BlockSpec((A, AE_p), lambda i: (0, 0)),        # expand (0/1)
                pl.BlockSpec((AE_p, E_p), lambda i: (0, 0)),      # pool (0/1)
                pl.BlockSpec((1, E_p), lambda i: (0, 0)),         # w_v2 row
                pl.BlockSpec(memory_space=pltpu.MemorySpace.SMEM),  # b_v2 scalar
            ],
            out_specs=pl.BlockSpec((1, tile_b), lambda i: (0, i)),
        ),
        compiler_params=pltpu.CompilerParams(
            dimension_semantics=("parallel",)),
    )(qs_flat, st_flat, w_cat, b_cat, expand, sum_pool, w_v2_row, b_v2)

    return out.reshape(bs, -1, 1)


def reference_forward(agent_qs, states, params, *, n_agents_inp, embed_dim):
    """Pure-JAX replica of UnconstrainedQMixer.forward (hypernet_layers=1)."""
    bs = agent_qs.shape[0]
    A, E = n_agents_inp, embed_dim
    S = params["w_b1"].shape[0]
    st = states.reshape(-1, S)
    qs = agent_qs.reshape(-1, 1, A)
    w1 = (st @ params["w_w1"] + params["b_w1"]).reshape(-1, A, E)
    b1 = (st @ params["w_b1"] + params["b_b1"]).reshape(-1, 1, E)
    hidden = jax.nn.elu(jnp.einsum("bia,bae->bie", qs, w1) + b1)
    wf = (st @ params["w_wf"] + params["b_wf"]).reshape(-1, E, 1)
    vh = jnp.maximum(st @ params["w_v1"] + params["b_v1"], 0.0)
    v = (vh @ params["w_v2"] + params["b_v2"]).reshape(-1, 1, 1)
    y = jnp.einsum("bie,bej->bij", hidden, wf) + v
    return y.reshape(bs, -1, 1)


if __name__ == "__main__":
    # Small, forward-consistent shapes.
    n_agents, n_actions = 4, 2
    A = n_agents * n_actions          # agent_input_size = 8
    S = 64                            # state_dim = prod(state_shape)
    E = 32                            # mixing_embed_dim
    bs, T = 2, 8                      # B = 16 flattened rows

    key = jax.random.PRNGKey(0)
    ks = jax.random.split(key, 12)
    scale = 0.1
    params = {
        "w_w1": scale * jax.random.normal(ks[0], (S, A * E), jnp.float32),
        "b_w1": scale * jax.random.normal(ks[1], (1, A * E), jnp.float32),
        "w_b1": scale * jax.random.normal(ks[2], (S, E), jnp.float32),
        "b_b1": scale * jax.random.normal(ks[3], (1, E), jnp.float32),
        "w_wf": scale * jax.random.normal(ks[4], (S, E), jnp.float32),
        "b_wf": scale * jax.random.normal(ks[5], (1, E), jnp.float32),
        "w_v1": scale * jax.random.normal(ks[6], (S, E), jnp.float32),
        "b_v1": scale * jax.random.normal(ks[7], (1, E), jnp.float32),
        "w_v2": scale * jax.random.normal(ks[8], (E, 1), jnp.float32),
        "b_v2": scale * jax.random.normal(ks[9], (1, 1), jnp.float32),
    }
    agent_qs = jax.random.normal(ks[10], (bs, T, A), jnp.float32)
    states = jax.random.normal(ks[11], (bs, T, S), jnp.float32)

    q_ref = reference_forward(agent_qs, states, params,
                              n_agents_inp=A, embed_dim=E)

    # 1) f32 MXU-input path: tight check against the f32 reference.
    q_f32 = unconstrained_qmix_forward(
        agent_qs, states, params, n_agents_inp=A, embed_dim=E,
        tile_b=1024, compute_dtype=jnp.float32)
    q_f32 = jax.block_until_ready(q_f32)
    assert q_f32.shape == (bs, T, 1), q_f32.shape
    assert jnp.allclose(q_f32, q_ref, atol=1e-3, rtol=1e-3), (
        float(jnp.max(jnp.abs(q_f32 - q_ref))))

    # 2) bf16 hypernet-GEMM path (the performance default): only states/w_cat
    #    are rounded; the mixing matmuls stay f32.  Check normalized by scale.
    q_bf16 = unconstrained_qmix_forward(
        agent_qs, states, params, n_agents_inp=A, embed_dim=E,
        tile_b=1024, compute_dtype=jnp.bfloat16)
    q_bf16 = jax.block_until_ready(q_bf16)
    max_ref = float(jnp.max(jnp.abs(q_ref)))
    max_err = float(jnp.max(jnp.abs(q_bf16 - q_ref)))
    assert max_err <= 0.1 * (max_ref + 1.0), (max_err, max_ref)

    print("KERNEL_OK")
</pallas_src>

<mosaic_0001>
module attributes {stable_mosaic.version = 11 : i64} {
  func.func @qmix_kernel(%arg0: i32, %arg1: memref<128x8xf32, #tpu.memory_space<vmem>>, %arg2: memref<128x64xf32, #tpu.memory_space<vmem>>, %arg3: memref<64x640xf32, #tpu.memory_space<vmem>>, %arg4: memref<1x640xf32, #tpu.memory_space<vmem>>, %arg5: memref<8x256xf32, #tpu.memory_space<vmem>>, %arg6: memref<256x128xf32, #tpu.memory_space<vmem>>, %arg7: memref<1x128xf32, #tpu.memory_space<vmem>>, %arg8: memref<1x1xf32, #tpu.memory_space<smem>>, %arg9: memref<1x128xf32, #tpu.memory_space<vmem>>) attributes {dimension_semantics = [#tpu.dimension_semantics<parallel>], iteration_bounds = array<i64: 1>, scalar_prefetch = 0 : i64, scratch_operands = 0 : i64, tpu.core_type = #tpu.core_type<tc>, window_params = [{transform_indices = @transform_0, window_bounds = array<i64: 128, 8>}, {transform_indices = @transform_1, window_bounds = array<i64: 128, 64>}, {pipeline_mode = #tpu.pipeline_mode<synchronous>, transform_indices = @transform_2, window_bounds = array<i64: 64, 640>}, {pipeline_mode = #tpu.pipeline_mode<synchronous>, transform_indices = @transform_3, window_bounds = array<i64: 1, 640>}, {pipeline_mode = #tpu.pipeline_mode<synchronous>, transform_indices = @transform_4, window_bounds = array<i64: 8, 256>}, {pipeline_mode = #tpu.pipeline_mode<synchronous>, transform_indices = @transform_5, window_bounds = array<i64: 256, 128>}, {pipeline_mode = #tpu.pipeline_mode<synchronous>, transform_indices = @transform_6, window_bounds = array<i64: 1, 128>}, {transform_indices = @transform_7, window_bounds = array<i64: 1, 1>}, {transform_indices = @transform_8, window_bounds = array<i64: 1, 128>}]} {
    %c0 = arith.constant 0 : index
    %c0_0 = arith.constant 0 : index
    %0 = vector.load %arg2[%c0, %c0_0] : memref<128x64xf32, #tpu.memory_space<vmem>>, vector<128x64xf32>
    %c0_1 = arith.constant 0 : index
    %c0_2 = arith.constant 0 : index
    %1 = vector.load %arg3[%c0_1, %c0_2] : memref<64x640xf32, #tpu.memory_space<vmem>>, vector<64x640xf32>
    %cst = arith.constant dense<0.000000e+00> : vector<128x640xf32>
    %2 = tpu.matmul %0, %1, %cst {dimension_numbers = #tpu.dot_dimension_numbers<[1], [0], [0], [1], [0, 0, 1, 1], [], []>} : vector<128x64xf32>, vector<64x640xf32>, vector<128x640xf32> -> vector<128x640xf32>
    %c0_3 = arith.constant 0 : index
    %c0_4 = arith.constant 0 : index
    %3 = vector.load %arg4[%c0_3, %c0_4] : memref<1x640xf32, #tpu.memory_space<vmem>>, vector<1x640xf32>
    %4 = vector.broadcast %3 : vector<1x640xf32> to vector<128x640xf32>
    %5 = arith.addf %2, %4 : vector<128x640xf32>
    %6 = vector.extract_strided_slice %5 {offsets = [0, 0], sizes = [128, 256], strides = [1, 1]} : vector<128x640xf32> to vector<128x256xf32>
    %7 = vector.extract_strided_slice %5 {offsets = [0, 256], sizes = [128, 128], strides = [1, 1]} : vector<128x640xf32> to vector<128x128xf32>
    %8 = vector.extract_strided_slice %5 {offsets = [0, 384], sizes = [128, 128], strides = [1, 1]} : vector<128x640xf32> to vector<128x128xf32>
    %9 = vector.extract_strided_slice %5 {offsets = [0, 512], sizes = [128, 128], strides = [1, 1]} : vector<128x640xf32> to vector<128x128xf32>
    %cst_5 = arith.constant 0.000000e+00 : f32
    %10 = vector.broadcast %cst_5 : f32 to vector<128x128xf32>
    %11 = arith.maximumf %9, %10 : vector<128x128xf32>
    %c0_6 = arith.constant 0 : index
    %c0_7 = arith.constant 0 : index
    %12 = vector.load %arg1[%c0_6, %c0_7] : memref<128x8xf32, #tpu.memory_space<vmem>>, vector<128x8xf32>
    %c0_8 = arith.constant 0 : index
    %c0_9 = arith.constant 0 : index
    %13 = vector.load %arg5[%c0_8, %c0_9] : memref<8x256xf32, #tpu.memory_space<vmem>>, vector<8x256xf32>
    %cst_10 = arith.constant dense<0.000000e+00> : vector<128x256xf32>
    %14 = tpu.matmul %12, %13, %cst_10 {dimension_numbers = #tpu.dot_dimension_numbers<[1], [0], [0], [1], [0, 0, 1, 1], [], []>} : vector<128x8xf32>, vector<8x256xf32>, vector<128x256xf32> -> vector<128x256xf32>
    %15 = arith.mulf %14, %6 : vector<128x256xf32>
    %c0_11 = arith.constant 0 : index
    %c0_12 = arith.constant 0 : index
    %16 = vector.load %arg6[%c0_11, %c0_12] : memref<256x128xf32, #tpu.memory_space<vmem>>, vector<256x128xf32>
    %cst_13 = arith.constant dense<0.000000e+00> : vector<128x128xf32>
    %17 = tpu.matmul %15, %16, %cst_13 {dimension_numbers = #tpu.dot_dimension_numbers<[1], [0], [0], [1], [0, 0, 1, 1], [], []>} : vector<128x256xf32>, vector<256x128xf32>, vector<128x128xf32> -> vector<128x128xf32>
    %18 = arith.addf %17, %7 : vector<128x128xf32>
    %cst_14 = arith.constant 0.000000e+00 : f32
    %19 = vector.broadcast %cst_14 : f32 to vector<128x128xf32>
    %20 = arith.cmpf ogt, %18, %19 : vector<128x128xf32>
    %21 = math.exp %18 : vector<128x128xf32>
    %cst_15 = arith.constant 1.000000e+00 : f32
    %22 = vector.broadcast %cst_15 : f32 to vector<128x128xf32>
    %23 = arith.subf %21, %22 : vector<128x128xf32>
    %24 = arith.select %20, %18, %23 : vector<128x128xi1>, vector<128x128xf32>
    %25 = arith.mulf %24, %8 : vector<128x128xf32>
    %c0_16 = arith.constant 0 : index
    %c0_17 = arith.constant 0 : index
    %26 = vector.load %arg7[%c0_16, %c0_17] : memref<1x128xf32, #tpu.memory_space<vmem>>, vector<1x128xf32>
    %27 = vector.broadcast %26 : vector<1x128xf32> to vector<128x128xf32>
    %28 = arith.mulf %11, %27 : vector<128x128xf32>
    %29 = arith.addf %25, %28 : vector<128x128xf32>
    %cst_18 = arith.constant 1.000000e+00 : f32
    %30 = vector.broadcast %cst_18 : f32 to vector<1x128xf32>
    %cst_19 = arith.constant dense<0.000000e+00> : vector<1x128xf32>
    %31 = tpu.matmul %30, %29, %cst_19 {dimension_numbers = #tpu.dot_dimension_numbers<[1], [1], [0], [0], [0, 0, 1, 0], [], []>} : vector<1x128xf32>, vector<128x128xf32>, vector<1x128xf32> -> vector<1x128xf32>
    %c0_20 = arith.constant 0 : index
    %c0_21 = arith.constant 0 : index
    %32 = memref.load %arg8[%c0_20, %c0_21] : memref<1x1xf32, #tpu.memory_space<smem>>
    %33 = vector.broadcast %32 : f32 to vector<1x128xf32>
    %34 = arith.addf %31, %33 : vector<1x128xf32>
    %c0_22 = arith.constant 0 : index
    %c0_23 = arith.constant 0 : index
    %35 = vector.load %arg9[%c0_22, %c0_23] : memref<1x128xf32, #tpu.memory_space<vmem>>, vector<1x128xf32>
    tpu.vector_store %arg9[%c0_22, %c0_23], %34 {strides = array<i32>} : memref<1x128xf32, #tpu.memory_space<vmem>>, vector<1x128xf32>,
    return
  }
  func.func @transform_0(%arg0: i32) -> (i32, i32) {
    %c0_i32 = arith.constant 0 : i32
    %c0_i32_0 = arith.constant 0 : i32
    return %arg0, %c0_i32 : i32, i32
  }
  func.func @transform_1(%arg0: i32) -> (i32, i32) {
    %c0_i32 = arith.constant 0 : i32
    %c0_i32_0 = arith.constant 0 : i32
    return %arg0, %c0_i32 : i32, i32
  }
  func.func @transform_2(%arg0: i32) -> (i32, i32) {
    %c0_i32 = arith.constant 0 : i32
    %c0_i32_0 = arith.constant 0 : i32
    %c0_i32_1 = arith.constant 0 : i32
    return %c0_i32, %c0_i32_0 : i32, i32
  }
  func.func @transform_3(%arg0: i32) -> (i32, i32) {
    %c0_i32 = arith.constant 0 : i32
    %c0_i32_0 = arith.constant 0 : i32
    %c0_i32_1 = arith.constant 0 : i32
    return %c0_i32, %c0_i32_0 : i32, i32
  }
  func.func @transform_4(%arg0: i32) -> (i32, i32) {
    %c0_i32 = arith.constant 0 : i32
    %c0_i32_0 = arith.constant 0 : i32
    %c0_i32_1 = arith.constant 0 : i32
    return %c0_i32, %c0_i32_0 : i32, i32
  }
  func.func @transform_5(%arg0: i32) -> (i32, i32) {
    %c0_i32 = arith.constant 0 : i32
    %c0_i32_0 = arith.constant 0 : i32
    %c0_i32_1 = arith.constant 0 : i32
    return %c0_i32, %c0_i32_0 : i32, i32
  }
  func.func @transform_6(%arg0: i32) -> (i32, i32) {
    %c0_i32 = arith.constant 0 : i32
    %c0_i32_0 = arith.constant 0 : i32
    %c0_i32_1 = arith.constant 0 : i32
    return %c0_i32, %c0_i32_0 : i32, i32
  }
  func.func @transform_7(%arg0: i32) -> (i32, i32) {
    %c0_i32 = arith.constant 0 : i32
    %c0_i32_0 = arith.constant 0 : i32
    %c0_i32_1 = arith.constant 0 : i32
    return %c0_i32, %c0_i32_0 : i32, i32
  }
  func.func @transform_8(%arg0: i32) -> (i32, i32) {
    %c0_i32 = arith.constant 0 : i32
    %c0_i32_0 = arith.constant 0 : i32
    return %c0_i32, %arg0 : i32, i32
  }
}

</mosaic_0001>

<bundles_post_ra>
// kernel: tpu_custom_call.1
= control target key start
LH: loop header
LB: loop body
LE: loop exit
PB: predicated region body
PF: predicated region fallthrough
CT: control target
= control target key end

     0   :  { %14 = vsyncpa [#allocation4], 0  ;;  %s2648_s0 = inlined_call_operand.vmem [shape: f32[16,8], index: 0, kind: input, shape index: {}]   ;;  %s2649_s1 = inlined_call_operand.vmem [shape: f32[16,64], index: 1, kind: input, shape index: {}]   ;;  %s2650_s2 = inlined_call_operand.hbm [shape: f32[64,640], index: 2, kind: input, shape index: {}]   ;;  %s2651_s3 = inlined_call_operand.vmem [shape: f32[1,640], index: 3, kind: input, shape index: {}]   ;;  %s2652_s4 = inlined_call_operand.vmem [shape: f32[8,256], index: 4, kind: input, shape index: {}]   ;;  %s2653_s5 = inlined_call_operand.hbm [shape: f32[256,128], index: 5, kind: input, shape index: {}]   ;;  %s2654_s6 = inlined_call_operand.vmem [shape: f32[1,128], index: 6, kind: input, shape index: {}]   ;;  %s2655_s7 = inlined_call_operand.<no memory space> [shape: f32[1,1], index: 7, kind: input, shape index: {}]   ;;  %s2656_s8 = inlined_call_operand.hbm [shape: f32[1,16], index: 8, kind: output, shape index: {}]  }
   0x1   :  { %15 = vsyncpa [#allocation7], 0 }
   0x2   :  { %16 = vsyncpa [#allocation5], 0  ;;  %s1831_s27 = smov [#allocation3]   ;;  %s1759_s9 = scalar_lea.hbm %s2650_s2, 5120 }
   0x3   :  { %s26_s28 = sshll.u32 %s1831_s27, 4  ;;  %p1760_p0 = scmp.ne.s32.totalorder %s2650_s2, %s1759_s9  ;;  %s27_s28 = int_to_ptr.vmem [resolvable:$true] %s26_s28 }
   0x4   :  { %p1763_p1 = scmp.lt.u32.totalorder %s1759_s9, %s2650_s2 }
   0x6   :  { %p1765_p2 = pnand %p1763_p1, %p1760_p0 }
   0x8   :  { %1768 = shalt.err (!%p1765_p2)
}
   0x9   :  { %s1769_s14 = scalar_lea.vmem %s27_s28, 5120  ;;  %p1774_p4 = scmp.lt.s32.totalorder %s27_s28, %s27_s28 }
   0xa   :  { %p1770_p3 = scmp.ne.s32.totalorder %s27_s28, %s1769_s14  ;;  %p1775_p5 = scmp.lt.s32.totalorder %s1769_s14, %s1769_s14 }
   0xc   :  { %p1776_p6 = por %p1775_p5, %p1774_p4 }
   0xe   :  { %p1777_p7 = pnand %p1776_p6, %p1770_p3 }
  0x10   :  { %1780 = shalt.err (!%p1777_p7)
}
  0x11   :  { %s1832_s15 = smov 640   ;;  %s1833_s16 = smov 40  }
  0x12   :  { %32 = dma.hbm_to_vmem [thread:$0]  %s2650_s2, 5120, %s27_s28, [#allocation4], %s1832_s15, %s1832_s15, %s1833_s16  }
  0x13   :  { %s1834_s19 = smov [#allocation6]   ;;  %s1781_s23 = scalar_lea.hbm %s2653_s5, 4096 }
  0x14   :  { %s42_s20 = sshll.u32 %s1834_s19, 4  ;;  %p1782_p8 = scmp.ne.s32.totalorder %s2653_s5, %s1781_s23  ;;  %s43_s20 = int_to_ptr.vmem [resolvable:$true] %s42_s20 }
  0x15   :  { %p1785_p9 = scmp.lt.u32.totalorder %s1781_s23, %s2653_s5 }
  0x17   :  { %p1787_p10 = pnand %p1785_p9, %p1782_p8 }
  0x19   :  { %1790 = shalt.err (!%p1787_p10)
}
  0x1a   :  { %s1791_s29 = scalar_lea.vmem %s43_s20, 4096  ;;  %p1796_p12 = scmp.lt.s32.totalorder %s43_s20, %s43_s20 }
  0x1b   :  { %p1792_p11 = scmp.ne.s32.totalorder %s43_s20, %s1791_s29  ;;  %p1797_p13 = scmp.lt.s32.totalorder %s1791_s29, %s1791_s29 }
  0x1d   :  { %p1798_p0 = por %p1797_p13, %p1796_p12 }
  0x1f   :  { %p1799_p1 = pnand %p1798_p0, %p1792_p11 }
  0x21   :  { %1802 = shalt.err (!%p1799_p1)
}
  0x22   :  { %s1835_s2 = smov 128   ;;  %s1836_s28 = smov 8  }
  0x23   :  { %48 = dma.hbm_to_vmem [thread:$0]  %s2653_s5, 4096, %s43_s20, [#allocation7], %s1835_s2, %s1835_s2, %s1836_s28  }
  0x24   :  { %1825 = dma.done.wait [#allocation4], 5120  }
  0x25   :  { %1826 = vsyncadd [#allocation4], 4294962176 }
  0x26   :  { %1827 = dma.done.wait [#allocation7], 4096  }
  0x27   :  { %1828 = vsyncadd [#allocation7], 4294963200  ;;  %v2657_v0 = vmov 0.0   ;;  %v78_v1 = vld [vmem:[#allocation3 + $0x18] sm:$0xff]  ;;  %v83_v2 = vld [vmem:[#allocation3 + $0x40] sm:$0xff]  ;;  %vm142_vm0 = vcmask 523264  }
  0x28   :  { %416 = vmatprep.mubr.f32.mxu1 %v2657_v0  ;;  %255 = vmatprep.mubr.f32.mxu0 %v2657_v0  ;;  %v77_v3 = vld [vmem:[#allocation3 + $0x10] sm:$0xff]  ;;  %v1628_v4 = vpack.c.bf16 %v83_v2, %v78_v1  ;;  %v82_v5 = vld [vmem:[#allocation3 + $0x38] sm:$0xff]  ;;  %v88_v6 = vld [vmem:[#allocation3 + $0x68] sm:$0xff]  ;;  %vm692_vm1 = vcmask 64512   ;;  %vm1839_vm2 = vmmov 0   ;;  %s1841_s27 = smov [#allocation8]  }
  0x29   :  { %v93_v7 = vld [vmem:[#allocation3 + $0x90] sm:$0xff]  ;;  %v1630_v8 = vpack.c.bf16 %v82_v5, %v77_v3  ;;  %v87_v10 = vld [vmem:[#allocation3 + $0x60] sm:$0xff]  ;;  %v92_v11 = vld [vmem:[#allocation3 + $0x88] sm:$0xff]  ;;  %s1325_s29 = sshll.u32 %s1841_s27, 4  ;;  %s1326_s29 = int_to_ptr.vmem [resolvable:$true] %s1325_s29 }
  0x2a   :  { %v1632_v9 = vpack.c.bf16 %v93_v7, %v88_v6  ;;  %v98_v12 = vld [vmem:[#allocation3 + $0xb8] sm:$0xff]  ;;  %1629 = vmatprep.subr.bf16.mxu1 %v1628_v4  ;;  %v103_v13 = vld [vmem:[#allocation3 + $0xe0] sm:$0xff]  ;;  %v1634_v14 = vpack.c.bf16 %v92_v11, %v87_v10  ;;  %v97_v16 = vld [vmem:[#allocation3 + $0xb0] sm:$0xff]  ;;  %s1803_s2 = scalar_lea.vmem %s1326_s29, 16  ;;  %s1807_s28 = scalar_lea.vmem %s1326_s29, 32 }
  0x2b   :  { %1631 = vmatpush1.bf16.msra.mxu1 %v1630_v8  ;;  %v1636_v15 = vpack.c.bf16 %v103_v13, %v98_v12  ;;  %v102_v17 = vld [vmem:[#allocation3 + $0xd8] sm:$0xff]  ;;  %v108_v18 = vld [vmem:[#allocation3 + $0x108] sm:$0xff]  ;;  %v113_v19 = vld [vmem:[#allocation3 + $0x130] sm:$0xff]  ;;  %p1804_p2 = scmp.ne.s32.totalorder %s1326_s29, %s1803_s2  ;;  %p1808_p3 = scmp.lt.s32.totalorder %s1326_s29, %s1326_s29 }
  0x2c   :  { %1633 = vmatprep.subr.bf16.mxu1 %v1632_v9  ;;  %v1638_v20 = vpack.c.bf16 %v102_v17, %v97_v16  ;;  %v1640_v21 = vpack.c.bf16 %v113_v19, %v108_v18  ;;  %v107_v22 = vld [vmem:[#allocation3 + $0x100] sm:$0xff]  ;;  %v112_v23 = vld [vmem:[#allocation3 + $0x128] sm:$0xff]  ;;  %v81_v25 = vld [vmem:[#allocation3 + $0x30] sm:$0xff]  ;;  %p1809_p4 = scmp.lt.s32.totalorder %s1807_s28, %s1803_s2 }
  0x2d   :  { %v76_v24 = vld [vmem:[#allocation3 + $0x8] sm:$0xff]  ;;  %v75_v26 = vld [vmem:[#allocation3] sm:$0xff]  ;;  %v86_v29 = vld [vmem:[#allocation3 + $0x58] sm:$0xff]  ;;  %v1642_v30 = vpack.c.bf16 %v112_v23, %v107_v22 }
  0x2e   :  { %v1612_v27 = vpack.c.bf16 %v81_v25, %v76_v24  ;;  %v80_v28 = vld [vmem:[#allocation3 + $0x28] sm:$0xff]  ;;  %v91_v32 = vld [vmem:[#allocation3 + $0x80] sm:$0xff]  ;;  %v85_v33 = vld [vmem:[#allocation3 + $0x50] sm:$0xff]  ;;  %p1810_p5 = por %p1809_p4, %p1808_p3 }
  0x2f   :  { %1635 = vmatpush1.bf16.msra.mxu1 %v1634_v14  ;;  %v1614_v31 = vpack.c.bf16 %v80_v28, %v75_v26  ;;  %v90_v34 = vld [vmem:[#allocation3 + $0x78] sm:$0xff]  ;;  %v1616_v35 = vpack.c.bf16 %v91_v32, %v86_v29  ;;  %v96_v36 = vld [vmem:[#allocation3 + $0xa8] sm:$0xff]  ;;  %v101_v37 = vld [vmem:[#allocation3 + $0xd0] sm:$0xff] }
  0x30   :  { %1637 = vmatprep.subr.bf16.mxu1 %v1636_v15  ;;  %1613 = vmatprep.subr.bf16.mxu0 %v1612_v27  ;;  %v691_v38 = vld [vmem:[%s2652_s4 + $0x8] sm:$0xff]  ;;  %v1618_v39 = vpack.c.bf16 %v90_v34, %v85_v33  ;;  %v1620_v40 = vpack.c.bf16 %v101_v37, %v96_v36  ;;  %v95_v41 = vld [vmem:[#allocation3 + $0xa0] sm:$0xff]  ;;  %v106_v44 = vld [vmem:[#allocation3 + $0xf8] sm:$0xff]  ;;  %p1811_p6 = pnand %p1810_p5, %p1804_p2 }
  0x31   :  { %1615 = vmatpush1.bf16.msra.mxu0 %v1614_v31  ;;  %v100_v42 = vld [vmem:[#allocation3 + $0xc8] sm:$0xff]  ;;  %v1919_v43 = vld [vmem:[%s2649_s1] sm:$0xff]  ;;  %v105_v49 = vld [vmem:[#allocation3 + $0xf0] sm:$0xff] }
  0x32   :  { %1617 = vmatprep.subr.bf16.mxu0 %v1616_v35  ;;  %v111_v45 = vld [vmem:[#allocation3 + $0x120] sm:$0xff]  ;;  %v1622_v47 = vpack.c.bf16 %v100_v42, %v95_v41  ;;  %v110_v50 = vld [vmem:[#allocation3 + $0x118] sm:$0xff]  ;;  %v1930_v51 = vld [vmem:[%s2649_s1 + $0x8] sm:$0xff] }
  0x33   :  { %1639 = vmatpush1.bf16.msra.mxu1 %v1638_v20  ;;  %v690_v46 = vld [vmem:[%s2652_s4] sm:$0xff]  ;;  %v1624_v48 = vpack.c.bf16 %v111_v45, %v106_v44  ;;  %v1626_v52 = vpack.c.bf16 %v110_v50, %v105_v49  ;;  %v84_v54 = vld [vmem:[#allocation3 + $0x48] sm:$0xff]  ;;  %v1938_v56 = vld [vmem:[%s2649_s1 + $0x10] sm:$0xff] }
  0x34   :  { %1641 = vmatprep.subr.bf16.mxu1 %v1640_v21  ;;  %v79_v53 = vld [vmem:[#allocation3 + $0x20] sm:$0xff]  ;;  %v89_v57 = vld [vmem:[#allocation3 + $0x70] sm:$0xff]  ;;  %v94_v58 = vld [vmem:[#allocation3 + $0x98] sm:$0xff] }
  0x35   :  { %1619 = vmatpush1.bf16.msra.mxu0 %v1618_v39  ;;  %v1644_v55 = vpack.c.bf16 %v84_v54, %v79_v53  ;;  %v1648_v59 = vpack.c.bf16 %v94_v58, %v89_v57  ;;  %v1946_v60 = vld [vmem:[%s2649_s1 + $0x18] sm:$0xff]  ;;  %v1957_v61 = vld [vmem:[%s2649_s1 + $0x20] sm:$0xff]  ;;  %v1968_v62 = vld [vmem:[%s2649_s1 + $0x28] sm:$0xff] }
  0x36   :  { %1621 = vmatprep.subr.bf16.mxu0 %v1620_v40  ;;  %v1979_v63 = vld [vmem:[%s2649_s1 + $0x30] sm:$0xff]  ;;  %v1990_v1 = vld [vmem:[%s2649_s1 + $0x38] sm:$0xff]  ;;  %v2001_v2 = vld [vmem:[%s2649_s1 + $0x40] sm:$0xff] }
  0x37   :  { %1643 = vmatpush1.bf16.msra.mxu1 %v1642_v30  ;;  %v2012_v3 = vld [vmem:[%s2649_s1 + $0x48] sm:$0xff]  ;;  %v2023_v4 = vld [vmem:[%s2649_s1 + $0x50] sm:$0xff]  ;;  %v2034_v5 = vld [vmem:[%s2649_s1 + $0x58] sm:$0xff] }
  0x38   :  { %741 = vmatprep.subr.mxu1 %v691_v38  ;;  %v2045_v6 = vld [vmem:[%s2649_s1 + $0x60] sm:$0xff]  ;;  %v2056_v7 = vld [vmem:[%s2649_s1 + $0x68] sm:$0xff]  ;;  %v2067_v8 = vld [vmem:[%s2649_s1 + $0x70] sm:$0xff] }
  0x39   :  { %1623 = vmatpush1.bf16.msra.mxu0 %v1622_v47  ;;  %v2078_v9 = vld [vmem:[%s2649_s1 + $0x78] sm:$0xff]  ;;  %v674_v10 = vld [vmem:[%s2648_s0] sm:$0xff]  ;;  %v675_v11 = vld [vmem:[%s2648_s0 + $0x8] sm:$0xff] }
  0x3a   :  { %1351 = vmatmul.mubr.msk.f32.vlgmr.msra.gmra.mrb[0].mxu1 %vm142_vm0, %v1919_v43  ;;  %1625 = vmatprep.subr.bf16.mxu0 %v1624_v48  ;;  %v676_v12 = vld [vmem:[%s2648_s0 + $0x10] sm:$0xff]  ;;  %v677_v13 = vld [vmem:[%s2648_s0 + $0x18] sm:$0xff]  ;;  %v678_v14 = vld [vmem:[%s2648_s0 + $0x20] sm:$0xff] }
  0x3b   :  { %742 = vmatpush1.msra.mxu1 %v690_v46  ;;  %422 = vmatprep.mubr.f32.mxu1 %v2657_v0  ;;  %v679_v15 = vld [vmem:[%s2648_s0 + $0x28] sm:$0xff]  ;;  %v680_v16 = vld [vmem:[%s2648_s0 + $0x30] sm:$0xff]  ;;  %v681_v17 = vld [vmem:[%s2648_s0 + $0x38] sm:$0xff] }
  0x3c   :  { %v99_v18 = vld [vmem:[#allocation3 + $0xc0] sm:$0xff]  ;;  %v104_v19 = vld [vmem:[#allocation3 + $0xe8] sm:$0xff]  ;;  %v684_v23 = vld [vmem:[%s2648_s0 + $0x50] sm:$0xff] }
  0x3d   :  { %1627 = vmatpush1.bf16.msra.mxu0 %v1626_v52  ;;  %v1652_v20 = vpack.c.bf16 %v104_v19, %v99_v18  ;;  %v682_v21 = vld [vmem:[%s2648_s0 + $0x40] sm:$0xff]  ;;  %v683_v22 = vld [vmem:[%s2648_s0 + $0x48] sm:$0xff]  ;;  %v685_v24 = vld [vmem:[%s2648_s0 + $0x58] sm:$0xff] }
  0x3e   :  { %1352 = vmatmul.mubr.msk.f32.gmra.mrb[2].mxu1 %vm142_vm0, %v1930_v51  ;;  %1645 = vmatprep.subr.bf16.mxu0 %v1644_v55  ;;  %v109_v25 = vld [vmem:[#allocation3 + $0x110] sm:$0xff]  ;;  %v114_v26 = vld [vmem:[#allocation3 + $0x138] sm:$0xff]  ;;  %v686_v28 = vld [vmem:[%s2648_s0 + $0x60] sm:$0xff] }
  0x3f   :  { %428 = vmatprep.mubr.f32.mxu1 %v2657_v0  ;;  %v1656_v27 = vpack.c.bf16 %v114_v26, %v109_v25  ;;  %v687_v29 = vld [vmem:[%s2648_s0 + $0x68] sm:$0xff]  ;;  %v688_v30 = vld [vmem:[%s2648_s0 + $0x70] sm:$0xff]  ;;  %v950_v31 = vld [vmem:[#allocation6 + $0x80] sm:$0xff] }
  0x40   :  { %1335 = vmatmul.mubr.msk.f32.vlgmr.msra.gmra.mrb[0].mxu0 %vm142_vm0, %v1919_v43  ;;  %v951_v32 = vld [vmem:[#allocation6 + $0x88] sm:$0xff]  ;;  %v934_v34 = vld [vmem:[#allocation6] sm:$0xff]  ;;  %v689_v37 = vld [vmem:[%s2648_s0 + $0x78] sm:$0xff] }
  0x41   :  { %261 = vmatprep.mubr.f32.mxu0 %v2657_v0  ;;  %1647 = vmatpush3.bf16.msra.mxu0 %v1644_v55  ;;  %v1660_v33 = vpack.c.bf16 %v951_v32, %v950_v31  ;;  %v935_v35 = vld [vmem:[#allocation6 + $0x8] sm:$0xff]  ;;  %v952_v38 = vld [vmem:[#allocation6 + $0x90] sm:$0xff]  ;;  %v953_v39 = vld [vmem:[#allocation6 + $0x98] sm:$0xff] }
  0x42   :  { %1353 = vmatmul.mubr.msk.f32.gmra.mrb[4].mxu1 %vm142_vm0, %v1938_v56  ;;  %1649 = vmatprep.subr.bf16.mxu0 %v1648_v59  ;;  %v1662_v36 = vpack.c.bf16 %v935_v35, %v934_v34  ;;  %v1664_v40 = vpack.c.bf16 %v953_v39, %v952_v38  ;;  %v936_v41 = vld [vmem:[#allocation6 + $0x10] sm:$0xff]  ;;  %v937_v42 = vld [vmem:[#allocation6 + $0x18] sm:$0xff]  ;;  %v954_v44 = vld [vmem:[#allocation6 + $0xa0] sm:$0xff] }
  0x43   :  { %434 = vmatprep.mubr.f32.mxu1 %v2657_v0  ;;  %v955_v45 = vld [vmem:[#allocation6 + $0xa8] sm:$0xff]  ;;  %v938_v47 = vld [vmem:[#allocation6 + $0x20] sm:$0xff]  ;;  %v956_v50 = vld [vmem:[#allocation6 + $0xb0] sm:$0xff] }
  0x44   :  { %1336 = vmatmul.mubr.msk.f32.gmra.mrb[2].mxu0 %vm142_vm0, %v1930_v51  ;;  %v1668_v46 = vpack.c.bf16 %v955_v45, %v954_v44  ;;  %v939_v48 = vld [vmem:[#allocation6 + $0x28] sm:$0xff]  ;;  %v940_v53 = vld [vmem:[#allocation6 + $0x30] sm:$0xff]  ;;  %v941_v54 = vld [vmem:[#allocation6 + $0x38] sm:$0xff] }
  0x45   :  { %267 = vmatprep.mubr.f32.mxu0 %v2657_v0  ;;  %1651 = vmatpush3.bf16.msra.mxu0 %v1648_v59  ;;  %v1670_v49 = vpack.c.bf16 %v939_v48, %v938_v47  ;;  %v1674_v55 = vpack.c.bf16 %v941_v54, %v940_v53  ;;  %v959_v57 = vld [vmem:[#allocation6 + $0xc8] sm:$0xff]  ;;  %v942_v59 = vld [vmem:[#allocation6 + $0x40] sm:$0xff] }
  0x46   :  { %1354 = vmatmul.mubr.msk.f32.gmra.mrb[6].mxu1 %vm142_vm0, %v1946_v60  ;;  %1653 = vmatprep.subr.bf16.mxu0 %v1652_v20 }
  0x47   :  { %440 = vmatprep.mubr.f32.mxu1 %v2657_v0 }
  0x48   :  { %1337 = vmatmul.mubr.msk.f32.gmra.mrb[4].mxu0 %vm142_vm0, %v1938_v56 }
  0x49   :  { %273 = vmatprep.mubr.f32.mxu0 %v2657_v0  ;;  %1655 = vmatpush3.bf16.msra.mxu0 %v1652_v20 }
  0x4a   :  { %1355 = vmatmul.mubr.msk.f32.gmra.mrb[8].mxu1 %vm142_vm0, %v1957_v61  ;;  %1657 = vmatprep.subr.bf16.mxu0 %v1656_v27 }
  0x4b   :  { %446 = vmatprep.mubr.f32.mxu1 %v2657_v0 }
  0x4c   :  { %1338 = vmatmul.mubr.msk.f32.gmra.mrb[6].mxu0 %vm142_vm0, %v1946_v60 }
  0x4d   :  { %279 = vmatprep.mubr.f32.mxu0 %v2657_v0  ;;  %1659 = vmatpush3.bf16.msra.mxu0 %v1656_v27 }
  0x4e   :  { %1356 = vmatmul.mubr.msk.f32.gmra.mrb[10].mxu1 %vm142_vm0, %v1968_v62  ;;  %1661 = vmatprep.subr.bf16.mxu0 %v1660_v33 }
  0x4f   :  { %452 = vmatprep.mubr.f32.mxu1 %v2657_v0 }
  0x50   :  { %1339 = vmatmul.mubr.msk.f32.gmra.mrb[8].mxu0 %vm142_vm0, %v1957_v61 }
  0x51   :  { %285 = vmatprep.mubr.f32.mxu0 %v2657_v0 }
  0x52   :  { %1357 = vmatmul.mubr.msk.f32.gmra.mrb[12].mxu1 %vm142_vm0, %v1979_v63 }
  0x53   :  { %458 = vmatprep.mubr.f32.mxu1 %v2657_v0 }
  0x54   :  { %1340 = vmatmul.mubr.msk.f32.gmra.mrb[10].mxu0 %vm142_vm0, %v1968_v62 }
  0x55   :  { %291 = vmatprep.mubr.f32.mxu0 %v2657_v0 }
  0x56   :  { %1358 = vmatmul.mubr.msk.f32.gmra.mrb[14].mxu1 %vm142_vm0, %v1990_v1 }
  0x57   :  { %464 = vmatprep.mubr.f32.mxu1 %v2657_v0 }
  0x58   :  { %1341 = vmatmul.mubr.msk.f32.gmra.mrb[12].mxu0 %vm142_vm0, %v1979_v63 }
  0x59   :  { %297 = vmatprep.mubr.f32.mxu0 %v2657_v0 }
  0x5a   :  { %1359 = vmatmul.mubr.msk.f32.gmra.mrb[16].mxu1 %vm142_vm0, %v2001_v2 }
  0x5b   :  { %470 = vmatprep.mubr.f32.mxu1 %v2657_v0 }
  0x5c   :  { %1342 = vmatmul.mubr.msk.f32.gmra.mrb[14].mxu0 %vm142_vm0, %v1990_v1 }
  0x5d   :  { %303 = vmatprep.mubr.f32.mxu0 %v2657_v0 }
  0x5e   :  { %1360 = vmatmul.mubr.msk.f32.gmra.mrb[18].mxu1 %vm142_vm0, %v2012_v3 }
  0x5f   :  { %476 = vmatprep.mubr.f32.mxu1 %v2657_v0 }
  0x60   :  { %1343 = vmatmul.mubr.msk.f32.gmra.mrb[16].mxu0 %vm142_vm0, %v2001_v2 }
  0x61   :  { %309 = vmatprep.mubr.f32.mxu0 %v2657_v0 }
  0x62   :  { %1361 = vmatmul.mubr.msk.f32.gmra.mrb[20].mxu1 %vm142_vm0, %v2023_v4 }
  0x63   :  { %482 = vmatprep.mubr.f32.mxu1 %v2657_v0 }
  0x64   :  { %1344 = vmatmul.mubr.msk.f32.gmra.mrb[18].mxu0 %vm142_vm0, %v2012_v3 }
  0x65   :  { %315 = vmatprep.mubr.f32.mxu0 %v2657_v0 }
  0x66   :  { %1362 = vmatmul.mubr.msk.f32.gmra.mrb[22].mxu1 %vm142_vm0, %v2034_v5 }
  0x67   :  { %488 = vmatprep.mubr.f32.mxu1 %v2657_v0 }
  0x68   :  { %1345 = vmatmul.mubr.msk.f32.gmra.mrb[20].mxu0 %vm142_vm0, %v2023_v4 }
  0x69   :  { %321 = vmatprep.mubr.f32.mxu0 %v2657_v0 }
  0x6a   :  { %1363 = vmatmul.mubr.msk.f32.gmra.mrb[24].mxu1 %vm142_vm0, %v2045_v6 }
  0x6b   :  { %494 = vmatprep.mubr.f32.mxu1 %v2657_v0 }
  0x6c   :  { %1346 = vmatmul.mubr.msk.f32.gmra.mrb[22].mxu0 %vm142_vm0, %v2034_v5 }
  0x6d   :  { %327 = vmatprep.mubr.f32.mxu0 %v2657_v0 }
  0x6e   :  { %1364 = vmatmul.mubr.msk.f32.gmra.mrb[26].mxu1 %vm142_vm0, %v2056_v7 }
  0x6f   :  { %500 = vmatprep.mubr.f32.mxu1 %v2657_v0 }
  0x70   :  { %1347 = vmatmul.mubr.msk.f32.gmra.mrb[24].mxu0 %vm142_vm0, %v2045_v6 }
  0x71   :  { %333 = vmatprep.mubr.f32.mxu0 %v2657_v0 }
  0x72   :  { %1365 = vmatmul.mubr.msk.f32.gmra.mrb[28].mxu1 %vm142_vm0, %v2067_v8 }
  0x73   :  { %506 = vmatprep.mubr.f32.mxu1 %v2657_v0 }
  0x74   :  { %1348 = vmatmul.mubr.msk.f32.gmra.mrb[26].mxu0 %vm142_vm0, %v2056_v7 }
  0x75   :  { %339 = vmatprep.mubr.f32.mxu0 %v2657_v0 }
  0x76   :  { %1366 = vmatmul.mubr.msk.f32.gmra.mrb[30].mxu1 %vm142_vm0, %v2078_v9 }
  0x77   :  { %805 = vmatprep.mubr.f32.mxu1 %v2657_v0 }
  0x78   :  { %1349 = vmatmul.mubr.msk.f32.gmra.mrb[28].mxu0 %vm142_vm0, %v2067_v8 }
  0x79   :  { %345 = vmatprep.mubr.f32.mxu0 %v2657_v0 }
  0x7a   :  { %1383 = vmatmul.mubr.msk.f32.vlgmr.msra.gmra.mrb[32].mxu1 %vm692_vm1, %v674_v10  ;;  %v963_v10 = vld [vmem:[#allocation6 + $0xe8] sm:$0xff] }
  0x7b   :  { %811 = vmatprep.mubr.f32.mxu1 %v2657_v0 }
  0x7c   :  { %1350 = vmatmul.mubr.msk.f32.gmra.mrb[30].mxu0 %vm142_vm0, %v2078_v9 }
  0x7d   :  { %1553 = vmatprep.mubr.msk.f32.mxu0 %vm142_vm0, %v1919_v43  ;;  %v1666_v43 = vpack.c.bf16 %v937_v42, %v936_v41 }
  0x7e   :  { %1384 = vmatmul.mubr.msk.f32.gmra.mrb[34].mxu1 %vm692_vm1, %v675_v11 }
  0x7f   :  { %817 = vmatprep.mubr.f32.mxu1 %v2657_v0 }
  0x80   :  { %1554 = vmatmul.mubr.msk.f32.vlgmr.msra.gmra.mrb[32].mxu0 %vm142_vm0, %v1930_v51  ;;  %v957_v51 = vld [vmem:[#allocation6 + $0xb8] sm:$0xff] }
  0x81   :  { %1556 = vmatprep.mubr.msk.f32.mxu0 %vm142_vm0, %v1938_v56  ;;  %1663 = vmatpush3.bf16.msra.mxu0 %v1662_v36  ;;  %v1672_v52 = vpack.c.bf16 %v957_v51, %v956_v50  ;;  %v958_v56 = vld [vmem:[#allocation6 + $0xc0] sm:$0xff] }
  0x82   :  { %1385 = vmatmul.mubr.msk.f32.gmra.mrb[36].mxu1 %vm692_vm1, %v676_v12  ;;  %1665 = vmatprep.subr.bf16.mxu0 %v1664_v40  ;;  %v1676_v58 = vpack.c.bf16 %v959_v57, %v958_v56  ;;  %v947_v12 = vld [vmem:[#allocation6 + $0x68] sm:$0xff] }
  0x83   :  { %823 = vmatprep.mubr.f32.mxu1 %v2657_v0 }
  0x84   :  { %1557 = vmatmul.mubr.msk.f32.gmra.mrb[34].mxu0 %vm142_vm0, %v1946_v60  ;;  %v943_v60 = vld [vmem:[#allocation6 + $0x48] sm:$0xff] }
  0x85   :  { %1559 = vmatprep.mubr.msk.f32.mxu0 %vm142_vm0, %v1957_v61  ;;  %1667 = vmatpush3.bf16.msra.mxu0 %v1666_v43  ;;  %v1678_v61 = vpack.c.bf16 %v943_v60, %v942_v59  ;;  %v117_v60 = vlaneseq }
  0x86   :  { %1386 = vmatmul.mubr.msk.f32.gmra.mrb[38].mxu1 %vm692_vm1, %v677_v13  ;;  %1669 = vmatprep.subr.bf16.mxu0 %v1668_v46 }
  0x87   :  { %829 = vmatprep.mubr.f32.mxu1 %v2657_v0 }
  0x88   :  { %1560 = vmatmul.mubr.msk.f32.gmra.mrb[36].mxu0 %vm142_vm0, %v1968_v62  ;;  %v960_v62 = vld [vmem:[#allocation6 + $0xd0] sm:$0xff] }
  0x89   :  { %1562 = vmatprep.mubr.msk.f32.mxu0 %vm142_vm0, %v1979_v63  ;;  %1671 = vmatpush3.bf16.msra.mxu0 %v1670_v49  ;;  %v961_v63 = vld [vmem:[#allocation6 + $0xd8] sm:$0xff] }
  0x8a   :  { %1387 = vmatmul.mubr.msk.f32.gmra.mrb[40].mxu1 %vm692_vm1, %v678_v14  ;;  %1673 = vmatprep.subr.bf16.mxu0 %v1672_v52  ;;  %v964_v14 = vld [vmem:[#allocation6 + $0xf0] sm:$0xff] }
  0x8b   :  { %835 = vmatprep.mubr.f32.mxu1 %v2657_v0 }
  0x8c   :  { %1563 = vmatmul.mubr.msk.f32.gmra.mrb[38].mxu0 %vm142_vm0, %v1990_v1  ;;  %v1680_v1 = vpack.c.bf16 %v961_v63, %v960_v62 }
  0x8d   :  { %1565 = vmatprep.mubr.msk.f32.mxu0 %vm142_vm0, %v2001_v2  ;;  %1675 = vmatpush3.bf16.msra.mxu0 %v1674_v55  ;;  %v944_v2 = vld [vmem:[#allocation6 + $0x50] sm:$0xff] }
  0x8e   :  { %1388 = vmatmul.mubr.msk.f32.gmra.mrb[42].mxu1 %vm692_vm1, %v679_v15  ;;  %1677 = vmatprep.subr.bf16.mxu0 %v1676_v58  ;;  %v965_v15 = vld [vmem:[#allocation6 + $0xf8] sm:$0xff] }
  0x8f   :  { %841 = vmatprep.mubr.f32.mxu1 %v2657_v0 }
  0x90   :  { %1566 = vmatmul.mubr.msk.f32.gmra.mrb[40].mxu0 %vm142_vm0, %v2012_v3  ;;  %v945_v3 = vld [vmem:[#allocation6 + $0x58] sm:$0xff] }
  0x91   :  { %1568 = vmatprep.mubr.msk.f32.mxu0 %vm142_vm0, %v2023_v4  ;;  %1679 = vmatpush3.bf16.msra.mxu0 %v1678_v61  ;;  %v1682_v4 = vpack.c.bf16 %v945_v3, %v944_v2  ;;  %v2293_v2 = vshrl.u32 %v117_v60, 7 }
  0x92   :  { %1389 = vmatmul.mubr.msk.f32.gmra.mrb[44].mxu1 %vm692_vm1, %v680_v16  ;;  %1681 = vmatprep.subr.bf16.mxu0 %v1680_v1  ;;  %v948_v16 = vld [vmem:[#allocation6 + $0x70] sm:$0xff] }
  0x93   :  { %847 = vmatprep.mubr.f32.mxu1 %v2657_v0 }
  0x94   :  { %1569 = vmatmul.mubr.msk.f32.gmra.mrb[42].mxu0 %vm142_vm0, %v2034_v5  ;;  %v962_v5 = vld [vmem:[#allocation6 + $0xe0] sm:$0xff] }
  0x95   :  { %1571 = vmatprep.mubr.msk.f32.mxu0 %vm142_vm0, %v2045_v6  ;;  %1683 = vmatpush3.bf16.msra.mxu0 %v1682_v4  ;;  %v1684_v11 = vpack.c.bf16 %v963_v10, %v962_v5  ;;  %v946_v6 = vld [vmem:[#allocation6 + $0x60] sm:$0xff]  ;;  %v119_v10 = vsub.s32 0, %v2293_v2 }
  0x96   :  { %1390 = vmatmul.mubr.msk.f32.gmra.mrb[46].mxu1 %vm692_vm1, %v681_v17  ;;  %v1686_v13 = vpack.c.bf16 %v947_v12, %v946_v6  ;;  %v949_v17 = vld [vmem:[#allocation6 + $0x78] sm:$0xff] }
  0x97   :  { %853 = vmatprep.mubr.f32.mxu1 %v2657_v0  ;;  %1685 = vmatprep.subr.bf16.mxu0 %v1684_v11  ;;  %v1690_v18 = vpack.c.bf16 %v949_v17, %v948_v16  ;;  %v123_v11 = vsub.s32 1, %v2293_v2 }
  0x98   :  { %1572 = vmatmul.mubr.msk.f32.gmra.mrb[44].mxu0 %vm142_vm0, %v2056_v7  ;;  %v1688_v7 = vpack.c.bf16 %v965_v15, %v964_v14 }
  0x99   :  { %1574 = vmatprep.mubr.msk.f32.mxu0 %vm142_vm0, %v2067_v8  ;;  %1687 = vmatpush3.bf16.msra.mxu0 %v1686_v13  ;;  %v2310_v13 = vld [vmem:[%s2651_s3] sm:$0x1f] }
  0x9a   :  { %1391 = vmatmul.mubr.msk.f32.gmra.mrb[48].mxu1 %vm692_vm1, %v682_v21  ;;  %1689 = vmatprep.subr.bf16.mxu0 %v1688_v7  ;;  %v2317_v7 = vrot.slane %v2310_v13, %v119_v10  ;;  %v2320_v16 = vrot.slane %v2310_v13, %v123_v11 }
  0x9b   :  { %859 = vmatprep.mubr.f32.mxu1 %v2657_v0 }
  0x9c   :  { %1575 = vmatmul.mubr.msk.f32.gmra.mrb[46].mxu0 %vm142_vm0, %v2078_v9 }
  0x9d   :  { %1691 = vmatpush3.bf16.msra.mxu0 %v1690_v18 }
  0x9e   :  { %1392 = vmatmul.mubr.msk.f32.gmra.mrb[50].mxu1 %vm692_vm1, %v683_v22 }
  0x9f   :  { %865 = vmatprep.mubr.f32.mxu1 %v2657_v0 }
  0xa2   :  { %1393 = vmatmul.mubr.msk.f32.gmra.mrb[52].mxu1 %vm692_vm1, %v684_v23 }
  0xa3   :  { %871 = vmatprep.mubr.f32.mxu1 %v2657_v0 }
  0xa6   :  { %1394 = vmatmul.mubr.msk.f32.gmra.mrb[54].mxu1 %vm692_vm1, %v685_v24 }
  0xa7   :  { %877 = vmatprep.mubr.f32.mxu1 %v2657_v0 }
  0xaa   :  { %1395 = vmatmul.mubr.msk.f32.gmra.mrb[56].mxu1 %vm692_vm1, %v686_v28 }
  0xab   :  { %883 = vmatprep.mubr.f32.mxu1 %v2657_v0 }
  0xae   :  { %1396 = vmatmul.mubr.msk.f32.gmra.mrb[58].mxu1 %vm692_vm1, %v687_v29 }
  0xaf   :  { %889 = vmatprep.mubr.f32.mxu1 %v2657_v0 }
  0xb2   :  { %1397 = vmatmul.mubr.msk.f32.gmra.mrb[60].mxu1 %vm692_vm1, %v688_v30 }
  0xb3   :  { %895 = vmatprep.mubr.f32.mxu1 %v2657_v0 }
  0xb6   :  { %1398 = vmatmul.mubr.msk.f32.gmra.mrb[62].mxu1 %vm692_vm1, %v689_v37 }
 0x10d   :  { %v2205_v8 = vpop.f32.mrb[0].mxu1 }
 0x10e   :  { %v2207_v19 = vpop.f32.mrb[1].mxu1 }
 0x111   :  { %v2209_v20 = vpop.f32.mrb[2].mxu1 }
 0x112   :  { %v2211_v21 = vpop.f32.mrb[3].mxu1 }
 0x113   :  { %v257_v23 = vpop.f32.mrb[0].mxu0 }
 0x114   :  { %v259_v24 = vpop.f32.mrb[1].mxu0  ;;  %v258_v0 = vadd.f32 %v257_v23, %v2317_v7 }
 0x115   :  { %v2213_v9 = vpop.f32.mrb[4].mxu1 }
 0x116   :  { %v2215_v22 = vpop.f32.mrb[5].mxu1 }
 0x117   :  { %v263_v27 = vpop.f32.mrb[2].mxu0 }
 0x118   :  { %v2221_v28 = vpop.f32.mrb[3].mxu0  ;;  %v264_v11 = vadd.f32 %v263_v27, %v2317_v7 }
 0x119   :  { %v2217_v25 = vpop.f32.mrb[6].mxu1 }
 0x11a   :  { %v2219_v26 = vpop.f32.mrb[7].mxu1 }
 0x11b   :  { %v2227_v31 = vpop.f32.mrb[4].mxu0 }
 0x11c   :  { %v2229_v32 = vpop.f32.mrb[5].mxu0 }
 0x11d   :  { %v2223_v29 = vpop.f32.mrb[8].mxu1  ;;  %v272_v27 = vadd.f32 %v2229_v32, %v2320_v16 }
 0x11e   :  { %v2225_v30 = vpop.f32.mrb[9].mxu1 }
 0x11f   :  { %v2235_v35 = vpop.f32.mrb[6].mxu0 }
 0x120   :  { %v2237_v36 = vpop.f32.mrb[7].mxu0 }
 0x121   :  { %v2231_v33 = vpop.f32.mrb[10].mxu1 }
 0x122   :  { %v2233_v34 = vpop.f32.mrb[11].mxu1 }
 0x123   :  { %v2243_v39 = vpop.f32.mrb[8].mxu0 }
 0x124   :  { %v2245_v40 = vpop.f32.mrb[9].mxu0  ;;  %v282_v32 = vadd.f32 %v2243_v39, %v2317_v7 }
 0x125   :  { %v2239_v37 = vpop.f32.mrb[12].mxu1 }
 0x126   :  { %v2241_v38 = vpop.f32.mrb[13].mxu1 }
 0x127   :  { %v2251_v43 = vpop.f32.mrb[10].mxu0 }
 0x128   :  { %v2253_v44 = vpop.f32.mrb[11].mxu0 }
 0x129   :  { %v2247_v41 = vpop.f32.mrb[14].mxu1 }
 0x12a   :  { %v2249_v42 = vpop.f32.mrb[15].mxu1 }
 0x12b   :  { %2658 = vst [vmem:[#allocation12_spill] sm:$0xff] %v2249_v42  ;;  %v2259_v47 = vpop.f32.mrb[12].mxu0 }
 0x12c   :  { %v2261_v48 = vpop.f32.mrb[13].mxu0 }
 0x12d   :  { %v2255_v45 = vpop.f32.mrb[16].mxu1 }
 0x12e   :  { %v2257_v46 = vpop.f32.mrb[17].mxu1 }
 0x12f   :  { %2659 = vst [vmem:[#allocation13_spill] sm:$0xff] %v2257_v46  ;;  %v2267_v51 = vpop.f32.mrb[14].mxu0  ;;  %v270_v46 = vadd.f32 %v2227_v31, %v2317_v7  ;;  %v278_v31 = vadd.f32 %v2237_v36, %v2320_v16 }
 0x130   :  { %v2269_v52 = vpop.f32.mrb[15].mxu0 }
 0x131   :  { %v2263_v49 = vpop.f32.mrb[18].mxu1 }
 0x132   :  { %v2265_v50 = vpop.f32.mrb[19].mxu1 }
 0x133   :  { %2660 = vst [vmem:[#allocation14_spill] sm:$0xff] %v2265_v50  ;;  %v2275_v55 = vpop.f32.mrb[16].mxu0 }
 0x134   :  { %v2277_v56 = vpop.f32.mrb[17].mxu0 }
 0x135   :  { %v2271_v53 = vpop.f32.mrb[20].mxu1 }
 0x136   :  { %v2273_v54 = vpop.f32.mrb[21].mxu1 }
 0x137   :  { %2661 = vst [vmem:[#allocation15_spill] sm:$0xff] %v2273_v54  ;;  %v2283_v59 = vpop.f32.mrb[18].mxu0 }
 0x138   :  { %v2285_v61 = vpop.f32.mrb[19].mxu0 }
 0x139   :  { %v2279_v57 = vpop.f32.mrb[22].mxu1 }
 0x13a   :  { %v2281_v58 = vpop.f32.mrb[23].mxu1 }
 0x13b   :  { %2662 = vst [vmem:[#allocation16_spill] sm:$0xff] %v2281_v58  ;;  %v2291_v1 = vpop.f32.mrb[20].mxu0 }
 0x13c   :  { %v2295_v3 = vpop.f32.mrb[21].mxu0 }
 0x13d   :  { %v2287_v62 = vpop.f32.mrb[24].mxu1 }
 0x13e   :  { %2663 = vst [vmem:[#allocation17_spill] sm:$0xff] %v2287_v62  ;;  %v2289_v63 = vpop.f32.mrb[25].mxu1 }
 0x13f   :  { %2664 = vst [vmem:[#allocation18_spill] sm:$0xff] %v2289_v63  ;;  %v2303_v6 = vpop.f32.mrb[22].mxu0  ;;  %v260_v63 = vadd.f32 %v259_v24, %v2320_v16 }
 0x140   :  { %v2305_v12 = vpop.f32.mrb[23].mxu0 }
 0x141   :  { %v2297_v4 = vpop.f32.mrb[26].mxu1 }
 0x142   :  { %2665 = vst [vmem:[#allocation19_spill] sm:$0xff] %v2297_v4  ;;  %v2299_v5 = vpop.f32.mrb[27].mxu1  ;;  %v266_v4 = vadd.f32 %v2221_v28, %v2320_v16 }
 0x143   :  { %2666 = vst [vmem:[#allocation20_spill] sm:$0xff] %v2299_v5  ;;  %v2322_v17 = vpop.f32.mrb[24].mxu0 }
 0x144   :  { %v2324_v18 = vpop.f32.mrb[25].mxu0 }
 0x145   :  { %v2312_v14 = vpop.f32.mrb[28].mxu1 }
 0x146   :  { %2667 = vst [vmem:[#allocation21_spill] sm:$0xff] %v2312_v14  ;;  %v2314_v15 = vpop.f32.mrb[29].mxu1 }
 0x147   :  { %2668 = vst [vmem:[#allocation22_spill] sm:$0xff] %v2314_v15  ;;  %v2332_v58 = vpop.f32.mrb[26].mxu0 }
 0x148   :  { %v2334_v15 = vpop.f32.mrb[27].mxu0 }
 0x149   :  { %v2326_v60 = vpop.f32.mrb[30].mxu1 }
 0x14a   :  { %2669 = vst [vmem:[#allocation23_spill] sm:$0xff] %v2326_v60  ;;  %v2329_v5 = vpop.f32.mrb[31].mxu1 }
 0x14b   :  { %2670 = vst [vmem:[#allocation24_spill] sm:$0xff] %v2329_v5  ;;  %v2339_v60 = vpop.f32.mrb[28].mxu0 }
 0x14c   :  { %v2341_v23 = vpop.f32.mrb[29].mxu0 }
 0x14d   :  { %v807_v10 = vpop.f32.mrb[32].mxu1 }
 0x14e   :  { %v902_v54 = vmul.f32 %v807_v10, %v258_v0  ;;  %v809_v14 = vpop.f32.mrb[33].mxu1 }
 0x14f   :  { %v903_v50 = vmul.f32 %v809_v14, %v260_v63  ;;  %v2347_v63 = vpop.f32.mrb[30].mxu0 }
 0x150   :  { %v2349_v14 = vpop.f32.mrb[31].mxu0 }
 0x151   :  { %v813_v5 = vpop.f32.mrb[34].mxu1  ;;  %1030 = vmatprep.mubr.f32.mxu0 %v903_v50  ;;  %v276_v50 = vadd.f32 %v2235_v35, %v2317_v7 }
 0x152   :  { %v904_v24 = vmul.f32 %v813_v5, %v264_v11  ;;  %v815_v62 = vpop.f32.mrb[35].mxu1  ;;  %1031 = vmatmul.mubr.f32.vlgmr.msra.gmra.mrb[48].mxu0 %v902_v54 }
 0x153   :  { %v905_v0 = vmul.f32 %v815_v62, %v266_v4 }
 0x155   :  { %v819_v28 = vpop.f32.mrb[36].mxu1  ;;  %1035 = vmatprep.mubr.f32.mxu0 %v905_v0 }
 0x156   :  { %v906_v10 = vmul.f32 %v819_v28, %v270_v46  ;;  %v821_v5 = vpop.f32.mrb[37].mxu1  ;;  %1036 = vmatmul.mubr.f32.gmra.mrb[50].mxu0 %v904_v24  ;;  %v284_v46 = vadd.f32 %v2245_v40, %v2320_v16  ;;  %v288_v24 = vadd.f32 %v2251_v43, %v2317_v7  ;;  %v290_v28 = vadd.f32 %v2253_v44, %v2320_v16 }
 0x157   :  { %v907_v11 = vmul.f32 %v821_v5, %v272_v27 }
 0x159   :  { %v825_v54 = vpop.f32.mrb[38].mxu1  ;;  %1040 = vmatprep.mubr.f32.mxu0 %v907_v11 }
 0x15a   :  { %v908_v62 = vmul.f32 %v825_v54, %v276_v50  ;;  %v827_v4 = vpop.f32.mrb[39].mxu1  ;;  %1041 = vmatmul.mubr.f32.gmra.mrb[52].mxu0 %v906_v10  ;;  %v294_v10 = vadd.f32 %v2259_v47, %v2317_v7 }
 0x15b   :  { %v909_v42 = vmul.f32 %v827_v4, %v278_v31  ;;  %v300_v31 = vadd.f32 %v2267_v51, %v2317_v7  ;;  %v306_v4 = vadd.f32 %v2275_v55, %v2317_v7 }
 0x15d   :  { %v831_v0 = vpop.f32.mrb[40].mxu1  ;;  %1045 = vmatprep.mubr.f32.mxu0 %v909_v42  ;;  %v296_v42 = vadd.f32 %v2261_v48, %v2320_v16 }
 0x15e   :  { %v910_v35 = vmul.f32 %v831_v0, %v282_v32  ;;  %v833_v27 = vpop.f32.mrb[41].mxu1  ;;  %1046 = vmatmul.mubr.f32.gmra.mrb[54].mxu0 %v908_v62  ;;  %v302_v62 = vadd.f32 %v2269_v52, %v2320_v16  ;;  %v308_v0 = vadd.f32 %v2277_v56, %v2320_v16 }
 0x15f   :  { %v911_v36 = vmul.f32 %v833_v27, %v284_v46 }
 0x161   :  { %v837_v50 = vpop.f32.mrb[42].mxu1  ;;  %1050 = vmatprep.mubr.f32.mxu0 %v911_v36  ;;  %v314_v36 = vadd.f32 %v2285_v61, %v2320_v16 }
 0x162   :  { %v912_v39 = vmul.f32 %v837_v50, %v288_v24  ;;  %v839_v5 = vpop.f32.mrb[43].mxu1  ;;  %1051 = vmatmul.mubr.f32.gmra.mrb[56].mxu0 %v910_v35  ;;  %v312_v24 = vadd.f32 %v2283_v59, %v2317_v7  ;;  %v318_v50 = vadd.f32 %v2291_v1, %v2317_v7 }
 0x163   :  { %v913_v40 = vmul.f32 %v839_v5, %v290_v28 }
 0x165   :  { %v843_v11 = vpop.f32.mrb[44].mxu1  ;;  %1055 = vmatprep.mubr.f32.mxu0 %v913_v40  ;;  %v324_v40 = vadd.f32 %v2303_v6, %v2317_v7  ;;  %v2391_v6 = vpop.f32.mrb[32].mxu0 }
 0x166   :  { %v914_v43 = vmul.f32 %v843_v11, %v294_v10  ;;  %v845_v54 = vpop.f32.mrb[45].mxu1  ;;  %1056 = vmatmul.mubr.f32.gmra.mrb[58].mxu0 %v912_v39  ;;  %v320_v10 = vadd.f32 %v2295_v3, %v2320_v16  ;;  %v326_v11 = vadd.f32 %v2305_v12, %v2320_v16  ;;  %v336_v12 = vadd.f32 %v2332_v58, %v2317_v7 }
 0x167   :  { %v915_v44 = vmul.f32 %v845_v54, %v296_v42 }
 0x169   :  { %v849_v32 = vpop.f32.mrb[46].mxu1  ;;  %1060 = vmatprep.mubr.f32.mxu0 %v915_v44  ;;  %v332_v44 = vadd.f32 %v2324_v18, %v2320_v16 }
 0x16a   :  { %v916_v47 = vmul.f32 %v849_v32, %v300_v31  ;;  %v851_v46 = vpop.f32.mrb[47].mxu1  ;;  %1061 = vmatmul.mubr.f32.gmra.mrb[60].mxu0 %v914_v43  ;;  %v330_v31 = vadd.f32 %v2322_v17, %v2317_v7  ;;  %v338_v17 = vadd.f32 %v2334_v15, %v2320_v16  ;;  %v348_v15 = vadd.f32 %v2347_v63, %v2317_v7 }
 0x16b   :  { %v917_v48 = vmul.f32 %v851_v46, %v302_v62 }
 0x16d   :  { %v855_v35 = vpop.f32.mrb[48].mxu1  ;;  %1065 = vmatprep.mubr.f32.mxu0 %v917_v48 }
 0x16e   :  { %v918_v51 = vmul.f32 %v855_v35, %v306_v4  ;;  %v857_v27 = vpop.f32.mrb[49].mxu1  ;;  %1066 = vmatmul.mubr.f32.gmra.mrb[62].mxu0 %v916_v47  ;;  %v2395_v4 = vpop.f32.mrb[33].mxu0  ;;  %v342_v35 = vadd.f32 %v2339_v60, %v2317_v7  ;;  %v350_v60 = vadd.f32 %v2349_v14, %v2320_v16 }
 0x16f   :  { %v919_v52 = vmul.f32 %v857_v27, %v308_v0  ;;  %v2399_v0 = vpop.f32.mrb[34].mxu0  ;;  %v344_v27 = vadd.f32 %v2341_v23, %v2320_v16 }
 0x171   :  { %v861_v28 = vpop.f32.mrb[50].mxu1  ;;  %1070 = vmatprep.mubr.f32.mxu0 %v919_v52 }
 0x172   :  { %v920_v55 = vmul.f32 %v861_v28, %v312_v24  ;;  %v863_v39 = vpop.f32.mrb[51].mxu1  ;;  %1071 = vmatmul.mubr.f32.gmra.mrb[64].mxu0 %v918_v51  ;;  %v2403_v24 = vpop.f32.mrb[35].mxu0 }
 0x173   :  { %v921_v56 = vmul.f32 %v863_v39, %v314_v36 }
 0x175   :  { %v867_v5 = vpop.f32.mrb[52].mxu1  ;;  %1075 = vmatprep.mubr.f32.mxu0 %v921_v56 }
 0x176   :  { %v922_v59 = vmul.f32 %v867_v5, %v318_v50  ;;  %v869_v42 = vpop.f32.mrb[53].mxu1  ;;  %1076 = vmatmul.mubr.f32.gmra.mrb[66].mxu0 %v920_v55  ;;  %v2411_v50 = vpop.f32.mrb[36].mxu0 }
 0x177   :  { %v923_v61 = vmul.f32 %v869_v42, %v320_v10  ;;  %v2413_v39 = vpop.f32.mrb[37].mxu0 }
 0x179   :  { %v873_v43 = vpop.f32.mrb[54].mxu1  ;;  %1080 = vmatprep.mubr.f32.mxu0 %v923_v61 }
 0x17a   :  { %v924_v1 = vmul.f32 %v873_v43, %v324_v40  ;;  %v875_v54 = vpop.f32.mrb[55].mxu1  ;;  %1081 = vmatmul.mubr.f32.gmra.mrb[68].mxu0 %v922_v59  ;;  %v2415_v59 = vpop.f32.mrb[38].mxu0 }
 0x17b   :  { %v925_v3 = vmul.f32 %v875_v54, %v326_v11  ;;  %v2417_v40 = vpop.f32.mrb[39].mxu0  ;;  %v127_v54 = vsub.s32 2, %v2293_v2 }
 0x17c   :  { %v2419_v7 = vpop.f32.mrb[40].mxu0 }
 0x17d   :  { %v879_v62 = vpop.f32.mrb[56].mxu1  ;;  %1085 = vmatprep.mubr.f32.mxu0 %v925_v3  ;;  %v2421_v63 = vpop.f32.mrb[41].mxu0  ;;  %v2439_v3 = vrot.slane %v2310_v13, %v127_v54 }
 0x17e   :  { %v926_v32 = vmul.f32 %v879_v62, %v330_v31  ;;  %v881_v47 = vpop.f32.mrb[57].mxu1  ;;  %1086 = vmatmul.mubr.f32.gmra.mrb[70].mxu0 %v924_v1  ;;  %v2423_v16 = vpop.f32.mrb[42].mxu0  ;;  %v1838_v1 = vmov 0.0|0.0   ;;  %v2671_v31 = vmov 0.0  }
 0x17f   :  { %v927_v46 = vmul.f32 %v881_v47, %v332_v44  ;;  %v2425_v14 = vpop.f32.mrb[43].mxu0  ;;  %1692 = vmatprep.subr.bf16.mxu1 %v1838_v1  ;;  %1609 = vmatprep.mubr.msk.f32.mxu1 %vm1839_vm2, %v2671_v31 }
 0x180   :  { %v2427_v42 = vpop.f32.mrb[44].mxu0 }
 0x181   :  { %v885_v48 = vpop.f32.mrb[58].mxu1  ;;  %1090 = vmatprep.mubr.f32.mxu0 %v927_v46  ;;  %v2429_v61 = vpop.f32.mrb[45].mxu0 }
 0x182   :  { %v928_v18 = vmul.f32 %v885_v48, %v336_v12  ;;  %v887_v51 = vpop.f32.mrb[59].mxu1  ;;  %1091 = vmatmul.mubr.f32.gmra.mrb[72].mxu0 %v926_v32  ;;  %v2431_v11 = vpop.f32.mrb[46].mxu0  ;;  %v419_v32 = vadd.f32 %v2205_v8, %v2439_v3  ;;  %v425_v48 = vadd.f32 %v2209_v20, %v2439_v3 }
 0x183   :  { %v929_v58 = vmul.f32 %v887_v51, %v338_v17  ;;  %v2433_v43 = vpop.f32.mrb[47].mxu0 }
 0x185   :  { %v891_v52 = vpop.f32.mrb[60].mxu1  ;;  %1095 = vmatprep.mubr.f32.mxu0 %v929_v58 }
 0x186   :  { %v930_v36 = vmul.f32 %v891_v52, %v342_v35  ;;  %v893_v28 = vpop.f32.mrb[61].mxu1  ;;  %1096 = vmatmul.mubr.f32.gmra.mrb[74].mxu0 %v928_v18  ;;  %v135_v18 = vsub.s32 4, %v2293_v2 }
 0x187   :  { %v931_v55 = vmul.f32 %v893_v28, %v344_v27 }
 0x188   :  { %v2449_v8 = vrot.slane %v2310_v13, %v135_v18 }
 0x189   :  { %v897_v56 = vpop.f32.mrb[62].mxu1  ;;  %1100 = vmatprep.mubr.f32.mxu0 %v931_v55  ;;  %v131_v55 = vsub.s32 3, %v2293_v2 }
 0x18a   :  { %v932_v10 = vmul.f32 %v897_v56, %v348_v15  ;;  %v899_v23 = vpop.f32.mrb[63].mxu1  ;;  %1101 = vmatmul.mubr.f32.gmra.mrb[76].mxu0 %v930_v36  ;;  %v431_v36 = vadd.f32 %v2213_v9, %v2439_v3 }
 0x18b   :  { %v933_v5 = vmul.f32 %v899_v23, %v350_v60  ;;  %v580_v23 = vadd.f32 %v2395_v4, %v2449_v8  ;;  %v2460_v31 = vrot.slane %v2310_v13, %v131_v55  ;;  %v2472_v13 = vld [vmem:[%s2654_s6] ss:$0 sm:$0xff] }
 0x18d   :  { %1105 = vmatprep.mubr.f32.mxu0 %v933_v5 }
 0x18e   :  { %1106 = vmatmul.mubr.f32.gmra.mrb[78].mxu0 %v932_v10  ;;  %v437_v10 = vadd.f32 %v2217_v25, %v2439_v3  ;;  %v443_v25 = vadd.f32 %v2223_v29, %v2439_v3  ;;  %v449_v29 = vadd.f32 %v2231_v33, %v2439_v3 }
 0x225   :  { %v1472_v44 = vpop.f32.mrb[48].mxu0 }
 0x226   :  { %v1473_v62 = vpop.f32.mrb[49].mxu0 }
 0x227   :  { %v1474_v12 = vadd.f32 %v1473_v62, %v1472_v44  ;;  %v585_v44 = vadd.f32 %v2391_v6, %v2449_v8 }
 0x229   :  { %v1033_v47 = vadd.f32 %v1474_v12, %v419_v32  ;;  %v1475_v46 = vpop.f32.mrb[50].mxu0  ;;  %v658_v12 = vmax.f32 %v580_v23, 0.0 }
 0x22a   :  { %v1476_v17 = vpop.f32.mrb[51].mxu0 }
 0x22b   :  { %v1127_v35 = vmul.f32 1.442695, %v1033_v47  ;;  %v1477_v51 = vadd.f32 %v1476_v17, %v1475_v46  ;;  %vm1111_vm3 = vcmp.gt.f32.partialorder %v1033_v47, 0.0 }
 0x22d   :  { %1727 = vpow2.f32 %v1127_v35  ;;  %v1038_v58 = vadd.f32 %v1477_v51, %v425_v48  ;;  %v1478_v27 = vpop.f32.mrb[52].mxu0  ;;  %v421_v48 = vadd.f32 %v2207_v19, %v2460_v31  ;;  %v659_v35 = vmax.f32 %v585_v44, 0.0 }
 0x22e   :  { %v1479_v52 = vpop.f32.mrb[53].mxu0  ;;  %v590_v51 = vadd.f32 %v2403_v24, %v2449_v8  ;;  %v455_v24 = vadd.f32 %v2239_v37, %v2439_v3 }
 0x22f   :  { %v1129_v15 = vmul.f32 1.442695, %v1038_v58  ;;  %v1480_v28 = vadd.f32 %v1479_v52, %v1478_v27  ;;  %vm1112_vm4 = vcmp.gt.f32.partialorder %v1038_v58, 0.0 }
 0x231   :  { %1729 = vpow2.f32 %v1129_v15  ;;  %v2452_v20 = vadd.f32 %v1480_v28, %v431_v36  ;;  %v1481_v60 = vpop.f32.mrb[54].mxu0  ;;  %v1214_v15 = vmul.f32 %v2472_v13, %v658_v12  ;;  %v433_v12 = vadd.f32 %v2215_v22, %v2460_v31 }
 0x232   :  { %v1482_v56 = vpop.f32.mrb[55].mxu0  ;;  %v600_v22 = vadd.f32 %v2413_v39, %v2449_v8 }
 0x233   :  { %v1131_v9 = vmul.f32 1.442695, %v2452_v20  ;;  %v1483_v5 = vadd.f32 %v1482_v56, %v1481_v60  ;;  %v427_v60 = vadd.f32 %v2211_v21, %v2460_v31  ;;  %vm1113_vm5 = vcmp.gt.f32.partialorder %v2452_v20, 0.0 }
 0x235   :  { %1731 = vpow2.f32 %v1131_v9  ;;  %v2462_v54 = vadd.f32 %v1483_v5, %v437_v10  ;;  %v1484_v2 = vpop.f32.mrb[56].mxu0  ;;  %v660_v9 = vmax.f32 %v590_v51, 0.0 }
 0x236   :  { %v1485_v62 = vpop.f32.mrb[57].mxu0 }
 0x237   :  { %v1728_v32 = vpop.eup %1727  ;;  %v1133_v4 = vmul.f32 1.442695, %v2462_v54  ;;  %v1486_v46 = vadd.f32 %v1485_v62, %v1484_v2  ;;  %v1215_v62 = vmul.f32 %v2472_v13, %v659_v35  ;;  %vm1114_vm6 = vcmp.gt.f32.partialorder %v2462_v54, 0.0 }
 0x238   :  { %v1399_v17 = vadd.f32 -1.0, %v1728_v32 }
 0x239   :  { %1733 = vpow2.f32 %v1133_v4  ;;  %v2476_v6 = vadd.f32 %v1486_v46, %v443_v25  ;;  %v1487_v18 = vpop.f32.mrb[58].mxu0 }
 0x23a   :  { %v1175_v27 = vsel %vm1111_vm3, %v1033_v47, %v1399_v17  ;;  %v1488_v52 = vpop.f32.mrb[59].mxu0  ;;  %v595_v47 = vadd.f32 %v2399_v0, %v2449_v8 }
 0x23b   :  { %v1730_v36 = vpop.eup %1729  ;;  %v1191_v28 = vmul.f32 %v1175_v27, %v421_v48  ;;  %v1135_v19 = vmul.f32 1.442695, %v2476_v6  ;;  %v1489_v55 = vadd.f32 %v1488_v52, %v1487_v18  ;;  %v1216_v48 = vmul.f32 %v2472_v13, %v660_v9 }
 0x23c   :  { %v1400_v56 = vadd.f32 -1.0, %v1730_v36  ;;  %v661_v17 = vmax.f32 %v595_v47, 0.0  ;;  %v439_v36 = vadd.f32 %v2219_v26, %v2460_v31  ;;  %vm1115_vm7 = vcmp.gt.f32.partialorder %v2476_v6, 0.0 }
 0x23d   :  { %1735 = vpow2.f32 %v1135_v19  ;;  %v2486_v33 = vadd.f32 %v1489_v55, %v449_v29  ;;  %v1490_v10 = vpop.f32.mrb[60].mxu0  ;;  %v1230_v23 = vadd.f32 %v1214_v15, %v1191_v28  ;;  %v467_v55 = vadd.f32 %v2255_v45, %v2439_v3 }
 0x23e   :  { %v1176_v5 = vsel %vm1112_vm4, %v1038_v58, %v1400_v56  ;;  %v1491_v2 = vpop.f32.mrb[61].mxu0  ;;  %v461_v58 = vadd.f32 %v2247_v41, %v2439_v3  ;;  %v1217_v39 = vmul.f32 %v2472_v13, %v661_v17  ;;  %v445_v45 = vadd.f32 %v2225_v30, %v2460_v31 }
 0x23f   :  { %v1732_v44 = vpop.eup %1731  ;;  %v1192_v21 = vmul.f32 %v1176_v5, %v427_v60  ;;  %v1137_v32 = vmul.f32 1.442695, %v2486_v33  ;;  %v1492_v25 = vadd.f32 %v1491_v2, %v1490_v10  ;;  %v605_v60 = vadd.f32 %v2411_v50, %v2449_v8 }
 0x240   :  { %v1401_v4 = vadd.f32 -1.0, %v1732_v44  ;;  %v473_v44 = vadd.f32 %v2263_v49, %v2439_v3  ;;  %vm1116_vm8 = vcmp.gt.f32.partialorder %v2486_v33, 0.0 }
 0x241   :  { %1737 = vpow2.f32 %v1137_v32  ;;  %v2497_v37 = vadd.f32 %v1492_v25, %v455_v24  ;;  %v1493_v0 = vpop.f32.mrb[62].mxu0  ;;  %v1231_v46 = vadd.f32 %v1215_v62, %v1192_v21  ;;  %v663_v62 = vmax.f32 %v605_v60, 0.0 }
 0x242   :  { %v1177_v18 = vsel %vm1113_vm5, %v2452_v20, %v1401_v4  ;;  %v1494_v29 = vpop.f32.mrb[63].mxu0  ;;  %v610_v21 = vadd.f32 %v2417_v40, %v2449_v8 }
 0x243   :  { %v1734_v35 = vpop.eup %1733  ;;  %v1193_v51 = vmul.f32 %v1177_v18, %v433_v12  ;;  %v1139_v27 = vmul.f32 1.442695, %v2497_v37  ;;  %v1495_v52 = vadd.f32 %v1494_v29, %v1493_v0  ;;  %v1693_v28 = vpack.c.bf16 %v1231_v46, %v1230_v23 }
 0x244   :  { %v1402_v15 = vadd.f32 -1.0, %v1734_v35  ;;  %v662_v23 = vmax.f32 %v600_v22, 0.0  ;;  %v479_v18 = vadd.f32 %v2271_v53, %v2439_v3  ;;  %v615_v29 = vadd.f32 %v2415_v59, %v2449_v8 }
 0x245   :  { %1739 = vpow2.f32 %v1139_v27  ;;  %v2509_v41 = vadd.f32 %v1495_v52, %v461_v58  ;;  %v1496_v20 = vpop.f32.mrb[64].mxu0  ;;  %v1232_v19 = vadd.f32 %v1216_v48, %v1193_v51  ;;  %1694 = vmatpush3.bf16.xpose.msra.mxu1 %v1693_v28  ;;  %v451_v58 = vadd.f32 %v2233_v34, %v2460_v31 }
 0x246   :  { %v1178_v56 = vsel %vm1114_vm6, %v2462_v54, %v1402_v15  ;;  %v1497_v26 = vpop.f32.mrb[65].mxu0  ;;  %1695 = vmatprep.subr.bf16.mxu1 %v1838_v1  ;;  %v1218_v30 = vmul.f32 %v2472_v13, %v662_v23  ;;  %v664_v35 = vmax.f32 %v610_v21, 0.0  ;;  %v1219_v27 = vmul.f32 %v2472_v13, %v663_v62 }
 0x247   :  { %v1736_v10 = vpop.eup %1735  ;;  %v1194_v24 = vmul.f32 %v1178_v56, %v439_v36  ;;  %v1141_v47 = vmul.f32 1.442695, %v2509_v41  ;;  %v1498_v9 = vadd.f32 %v1497_v26, %v1496_v20  ;;  %v457_v53 = vadd.f32 %v2241_v38, %v2460_v31 }
 0x248   :  { %v1403_v5 = vadd.f32 -1.0, %v1736_v10  ;;  %vm1117_vm9 = vcmp.gt.f32.partialorder %v2497_v37, 0.0  ;;  %v620_v38 = vadd.f32 %v2421_v63, %v2449_v8  ;;  %vm1118_vm10 = vcmp.gt.f32.partialorder %v2509_v41, 0.0 }
 0x249   :  { %1741 = vpow2.f32 %v1141_v47  ;;  %v2522_v50 = vadd.f32 %v1498_v9, %v467_v55  ;;  %v1499_v54 = vpop.f32.mrb[66].mxu0  ;;  %v1233_v2 = vadd.f32 %v1217_v39, %v1194_v24  ;;  %v665_v55 = vmax.f32 %v615_v29, 0.0  ;;  %v2672_v47 = vld [vmem:[#allocation12_spill] sm:$0xff] }
 0x24a   :  { %v1179_v32 = vsel %vm1115_vm7, %v2476_v6, %v1403_v5  ;;  %v1500_v25 = vpop.f32.mrb[67].mxu0  ;;  %v1220_v39 = vmul.f32 %v2472_v13, %v664_v35  ;;  %v463_v9 = vadd.f32 %v2672_v47, %v2460_v31  ;;  %v625_v62 = vadd.f32 %v2419_v7, %v2449_v8 }
 0x24b   :  { %v1738_v12 = vpop.eup %1737  ;;  %v1195_v4 = vmul.f32 %v1179_v32, %v445_v45  ;;  %v1143_v0 = vmul.f32 1.442695, %v2522_v50  ;;  %v1501_v46 = vadd.f32 %v1500_v25, %v1499_v54  ;;  %v1696_v48 = vpack.c.bf16 %v1233_v2, %v1232_v19  ;;  %v2673_v2 = vld [vmem:[#allocation17_spill] sm:$0xff] }
 0x24c   :  { %v1404_v17 = vadd.f32 -1.0, %v1738_v12  ;;  %v485_v19 = vadd.f32 %v2279_v57, %v2439_v3  ;;  %v1221_v63 = vmul.f32 %v2472_v13, %v665_v55  ;;  %v666_v12 = vmax.f32 %v620_v38, 0.0 }
 0x24d   :  { %1743 = vpow2.f32 %v1143_v0  ;;  %v2534_v49 = vadd.f32 %v1501_v46, %v473_v44  ;;  %v1502_v40 = vpop.f32.mrb[68].mxu0  ;;  %v1234_v6 = vadd.f32 %v1218_v30, %v1195_v4  ;;  %1697 = vmatpush3.bf16.xpose.msra.mxu1 %v1696_v48  ;;  %v491_v44 = vadd.f32 %v2673_v2, %v2439_v3  ;;  %v2674_v46 = vld [vmem:[#allocation13_spill] sm:$0xff] }
 0x24e   :  { %v1180_v22 = vsel %vm1116_vm8, %v2486_v33, %v1404_v17  ;;  %v1503_v34 = vpop.f32.mrb[69].mxu0  ;;  %1698 = vmatprep.subr.bf16.mxu1 %v1838_v1  ;;  %vm1119_vm11 = vcmp.gt.f32.partialorder %v2522_v50, 0.0  ;;  %v630_v29 = vadd.f32 %v2425_v14, %v2449_v8 }
 0x24f   :  { %v1740_v51 = vpop.eup %1739  ;;  %v1196_v52 = vmul.f32 %v1180_v22, %v451_v58  ;;  %v1145_v36 = vmul.f32 1.442695, %v2534_v49  ;;  %v1504_v15 = vadd.f32 %v1503_v34, %v1502_v40  ;;  %v469_v58 = vadd.f32 %v2674_v46, %v2460_v31  ;;  %v2675_v40 = vld [vmem:[#allocation19_spill] sm:$0xff] }
 0x250   :  { %v1405_v28 = vadd.f32 -1.0, %v1740_v51  ;;  %v1222_v51 = vmul.f32 %v2472_v13, %v666_v12  ;;  %vm1120_vm12 = vcmp.gt.f32.partialorder %v2534_v49, 0.0 }
 0x251   :  { %1745 = vpow2.f32 %v1145_v36  ;;  %v2547_v59 = vadd.f32 %v1504_v15, %v479_v18  ;;  %v1505_v33 = vpop.f32.mrb[70].mxu0  ;;  %v1235_v20 = vadd.f32 %v1219_v27, %v1196_v52  ;;  %v667_v18 = vmax.f32 %v625_v62, 0.0  ;;  %v2676_v15 = vld [vmem:[#allocation14_spill] sm:$0xff] }
 0x252   :  { %v1181_v60 = vsel %vm1117_vm9, %v2497_v37, %v1405_v28  ;;  %v1506_v56 = vpop.f32.mrb[71].mxu0 }
 0x253   :  { %v1742_v26 = vpop.eup %1741  ;;  %v1197_v10 = vmul.f32 %v1181_v60, %v457_v53  ;;  %v1147_v23 = vmul.f32 1.442695, %v2547_v59  ;;  %v1507_v24 = vadd.f32 %v1506_v56, %v1505_v33  ;;  %v1699_v5 = vpack.c.bf16 %v1235_v20, %v1234_v6 }
 0x254   :  { %v1406_v45 = vadd.f32 -1.0, %v1742_v26  ;;  %v497_v6 = vadd.f32 %v2675_v40, %v2439_v3  ;;  %v475_v53 = vadd.f32 %v2676_v15, %v2460_v31  ;;  %v668_v60 = vmax.f32 %v630_v29, 0.0 }
 0x255   :  { %1747 = vpow2.f32 %v1147_v23  ;;  %v2559_v57 = vadd.f32 %v1507_v24, %v485_v19  ;;  %v1508_v37 = vpop.f32.mrb[72].mxu0  ;;  %v1236_v54 = vadd.f32 %v1220_v39, %v1197_v10  ;;  %1700 = vmatpush3.bf16.xpose.msra.mxu1 %v1699_v5  ;;  %v2677_v19 = vld [vmem:[#allocation21_spill] sm:$0xff]  ;;  %v635_v39 = vadd.f32 %v2423_v16, %v2449_v8 }
 0x256   :  { %v1182_v21 = vsel %vm1118_vm10, %v2509_v41, %v1406_v45  ;;  %v1509_v32 = vpop.f32.mrb[73].mxu0  ;;  %1701 = vmatprep.subr.bf16.mxu1 %v1838_v1  ;;  %v503_v55 = vadd.f32 %v2677_v19, %v2439_v3  ;;  %v1223_v10 = vmul.f32 %v2472_v13, %v667_v18  ;;  %vm1121_vm13 = vcmp.gt.f32.partialorder %v2547_v59, 0.0 }
 0x257   :  { %v1744_v25 = vpop.eup %1743  ;;  %v1198_v30 = vmul.f32 %v1182_v21, %v463_v9  ;;  %v1149_v4 = vmul.f32 1.442695, %v2559_v57  ;;  %v1510_v0 = vadd.f32 %v1509_v32, %v1508_v37  ;;  %v2678_v9 = vld [vmem:[#allocation15_spill] sm:$0xff]  ;;  %vm1122_vm14 = vcmp.gt.f32.partialorder %v2559_v57, 0.0 }
 0x258   :  { %v1407_v17 = vadd.f32 -1.0, %v1744_v25  ;;  %v481_v45 = vadd.f32 %v2678_v9, %v2460_v31  ;;  %v640_v25 = vadd.f32 %v2429_v61, %v2449_v8 }
 0x259   :  { %1749 = vpow2.f32 %v1149_v4  ;;  %v2572_v7 = vadd.f32 %v1510_v0, %v491_v44  ;;  %v1511_v41 = vpop.f32.mrb[74].mxu0  ;;  %v1237_v48 = vadd.f32 %v1221_v63, %v1198_v30  ;;  %v669_v44 = vmax.f32 %v635_v39, 0.0  ;;  %v2680_v0 = vld [vmem:[#allocation16_spill] sm:$0xff] }
 0x25a   :  { %v1183_v35 = vsel %vm1119_vm11, %v2522_v50, %v1407_v17  ;;  %v1512_v22 = vpop.f32.mrb[75].mxu0  ;;  %v1224_v63 = vmul.f32 %v2472_v13, %v668_v60  ;;  %v487_v46 = vadd.f32 %v2680_v0, %v2460_v31  ;;  %v655_v39 = vadd.f32 %v2431_v11, %v2449_v8  ;;  %v2684_v11 = vld [vmem:[#allocation24_spill] sm:$0xff] }
 0x25b   :  { %v1746_v34 = vpop.eup %1745  ;;  %v1199_v27 = vmul.f32 %v1183_v35, %v469_v58  ;;  %v1151_v52 = vmul.f32 1.442695, %v2572_v7  ;;  %v1513_v36 = vadd.f32 %v1512_v22, %v1511_v41  ;;  %v1702_v33 = vpack.c.bf16 %v1237_v48, %v1236_v54  ;;  %v2679_v54 = vld [vmem:[#allocation23_spill] sm:$0xff]  ;;  %v2681_v22 = vld [vmem:[#allocation18_spill] sm:$0xff] }
 0x25c   :  { %v1408_v28 = vadd.f32 -1.0, %v1746_v34  ;;  %v509_v2 = vadd.f32 %v2679_v54, %v2439_v3  ;;  %v1225_v40 = vmul.f32 %v2472_v13, %v669_v44  ;;  %v493_v34 = vadd.f32 %v2681_v22, %v2460_v31 }
 0x25d   :  { %1751 = vpow2.f32 %v1151_v52  ;;  %v2584_v20 = vadd.f32 %v1513_v36, %v497_v6  ;;  %v1514_v14 = vpop.f32.mrb[76].mxu0  ;;  %v1238_v50 = vadd.f32 %v1222_v51, %v1199_v27  ;;  %1703 = vmatpush3.bf16.xpose.msra.mxu1 %v1702_v33  ;;  %v670_v6 = vmax.f32 %v640_v25, 0.0  ;;  %v2682_v33 = vld [vmem:[#allocation20_spill] sm:$0xff] }
 0x25e   :  { %v1184_v56 = vsel %vm1120_vm12, %v2534_v49, %v1408_v28  ;;  %v1515_v26 = vpop.f32.mrb[77].mxu0  ;;  %1704 = vmatprep.subr.bf16.mxu1 %v1838_v1  ;;  %vm1123_vm15 = vcmp.gt.f32.partialorder %v2572_v7, 0.0  ;;  %v650_v36 = vadd.f32 %v2433_v43, %v2449_v8 }
 0x25f   :  { %v1748_v38 = vpop.eup %1747  ;;  %v1200_v23 = vmul.f32 %v1184_v56, %v475_v53  ;;  %v1153_v24 = vmul.f32 1.442695, %v2584_v20  ;;  %v1516_v47 = vadd.f32 %v1515_v26, %v1514_v14  ;;  %v1226_v52 = vmul.f32 %v2472_v13, %v670_v6  ;;  %v2683_v26 = vld [vmem:[#allocation22_spill] sm:$0xff] }
 0x260   :  { %v1409_v5 = vadd.f32 -1.0, %v1748_v38  ;;  %v499_v14 = vadd.f32 %v2682_v33, %v2460_v31  ;;  %vm1124_vm0 = vcmp.gt.f32.partialorder %v2584_v20, 0.0  ;;  %v672_v60 = vmax.f32 %v650_v36, 0.0 }
 0x261   :  { %1753 = vpow2.f32 %v1153_v24  ;;  %v1103_v16 = vadd.f32 %v1516_v47, %v503_v55  ;;  %v1517_v49 = vpop.f32.mrb[78].mxu0  ;;  %v1239_v37 = vadd.f32 %v1223_v10, %v1200_v23  ;;  %v505_v38 = vadd.f32 %v2683_v26, %v2460_v31 }
 0x262   :  { %v1185_v62 = vsel %vm1121_vm13, %v2547_v59, %v1409_v5  ;;  %v1518_v21 = vpop.f32.mrb[79].mxu0  ;;  %v645_v59 = vadd.f32 %v2427_v42, %v2449_v8  ;;  %v1228_v47 = vmul.f32 %v2472_v13, %v672_v60  ;;  %v511_v8 = vadd.f32 %v2684_v11, %v2460_v31 }
 0x263   :  { %v1750_v32 = vpop.eup %1749  ;;  %v1201_v12 = vmul.f32 %v1185_v62, %v481_v45  ;;  %v1155_v30 = vmul.f32 1.442695, %v1103_v16  ;;  %v1519_v4 = vadd.f32 %v1518_v21, %v1517_v49  ;;  %v1705_v17 = vpack.c.bf16 %v1239_v37, %v1238_v50 }
 0x264   :  { %v1410_v58 = vadd.f32 -1.0, %v1750_v32  ;;  %v671_v42 = vmax.f32 %v645_v59, 0.0  ;;  %vm1125_vm1 = vcmp.gt.f32.partialorder %v1103_v16, 0.0  ;;  %v1247_v62 = vstv %s2655_s7 }
 0x265   :  { %1755 = vpow2.f32 %v1155_v30  ;;  %v1108_v3 = vadd.f32 %v1519_v4, %v509_v2  ;;  %v1240_v41 = vadd.f32 %v1224_v63, %v1201_v12  ;;  %1706 = vmatpush3.bf16.xpose.msra.mxu1 %v1705_v17  ;;  %v1840_v63 = vmov 1.0  }
 0x266   :  { %v1186_v48 = vsel %vm1122_vm14, %v2559_v57, %v1410_v58  ;;  %1707 = vmatprep.subr.bf16.mxu1 %v1838_v1 }
 0x267   :  { %v1752_v61 = vpop.eup %1751  ;;  %v1202_v18 = vmul.f32 %v1186_v48, %v487_v46  ;;  %v1157_v29 = vmul.f32 1.442695, %v1108_v3  ;;  %vm1126_vm2 = vcmp.gt.f32.partialorder %v1108_v3, 0.0 }
 0x268   :  { %v1411_v35 = vadd.f32 -1.0, %v1752_v61 }
 0x269   :  { %1757 = vpow2.f32 %v1157_v29  ;;  %v1241_v51 = vadd.f32 %v1225_v40, %v1202_v18 }
 0x26a   :  { %v1187_v57 = vsel %vm1123_vm15, %v2572_v7, %v1411_v35  ;;  %v1227_v7 = vmul.f32 %v2472_v13, %v671_v42 }
 0x26b   :  { %v1754_v27 = vpop.eup %1753  ;;  %v1203_v15 = vmul.f32 %v1187_v57, %v493_v34  ;;  %v1708_v53 = vpack.c.bf16 %v1241_v51, %v1240_v41 }
 0x26c   :  { %v1412_v28 = vadd.f32 -1.0, %v1754_v27 }
 0x26d   :  { %v1242_v50 = vadd.f32 %v1226_v52, %v1203_v15  ;;  %1709 = vmatpush3.bf16.xpose.msra.mxu1 %v1708_v53 }
 0x26e   :  { %v1188_v19 = vsel %vm1124_vm0, %v2584_v20, %v1412_v28  ;;  %1710 = vmatprep.subr.bf16.mxu1 %v1838_v1  ;;  %v673_v20 = vmax.f32 %v655_v39, 0.0 }
 0x26f   :  { %v1756_v55 = vpop.eup %1755  ;;  %v1204_v43 = vmul.f32 %v1188_v19, %v499_v14 }
 0x270   :  { %v1413_v56 = vadd.f32 -1.0, %v1756_v55  ;;  %v1229_v54 = vmul.f32 %v2472_v13, %v673_v20 }
 0x271   :  { %v1243_v10 = vadd.f32 %v1227_v7, %v1204_v43 }
 0x272   :  { %v1189_v23 = vsel %vm1125_vm1, %v1103_v16, %v1413_v56 }
 0x273   :  { %v1758_v24 = vpop.eup %1757  ;;  %v1205_v9 = vmul.f32 %v1189_v23, %v505_v38  ;;  %v1711_v45 = vpack.c.bf16 %v1243_v10, %v1242_v50 }
 0x274   :  { %v1414_v5 = vadd.f32 -1.0, %v1758_v24 }
 0x275   :  { %v1244_v49 = vadd.f32 %v1228_v47, %v1205_v9  ;;  %1712 = vmatpush3.bf16.xpose.msra.mxu1 %v1711_v45 }
 0x276   :  { %v1190_v37 = vsel %vm1126_vm2, %v1108_v3, %v1414_v5  ;;  %1713 = vmatprep.subr.bf16.mxu1 %v1838_v1 }
 0x277   :  { %v1206_v2 = vmul.f32 %v1190_v37, %v511_v8 }
 0x279   :  { %v1245_v16 = vadd.f32 %v1229_v54, %v1206_v2 }
 0x27b   :  { %v1714_v44 = vpack.c.bf16 %v1245_v16, %v1244_v49 }
 0x27d   :  { %1715 = vmatpush3.bf16.xpose.msra.mxu1 %v1714_v44 }
 0x284   :  { %1610 = vmatmul.mubr.f32.vlgmr.msra.gmra.mrb[64].mxu1 %v1840_v63 }
 0x357   :  { %v1314_v31 = vpop.f32.mrb[64].mxu1 }
 0x358   :  { %v1315_v21 = vadd.f32 %v1314_v31, %v1247_v62  ;;  %v1611_v32 = vpop.f32.mrb[65].mxu1 }
 0x35a   :  { %1318 = vst [vmem:[#allocation8] sm:$0x1] %v1315_v21 }
 0x35b   :  { %1814 = shalt.err (!%p1811_p6)
}
 0x35c   :  { %s1815_s5 = scalar_lea.hbm %s2656_s8, 16 }
 0x35d   :  { %p1816_p7 = scmp.ne.s32.totalorder %s2656_s8, %s1815_s5  ;;  %p1819_p8 = scmp.lt.u32.totalorder %s1815_s5, %s2656_s8 }
 0x35f   :  { %p1821_p9 = pnand %p1819_p8, %p1816_p7 }
 0x361   :  { %1824 = shalt.err (!%p1821_p9)
}
 0x362   :  { %1328 = dma.vmem_to_hbm [thread:$0]  %s1326_s29, 16, %s2656_s8, [#allocation5]  }
 0x363   :  { %1829 = dma.done.wait [#allocation5], 16  }
 0x364   :  { %1830 = vsyncadd [#allocation5], 4294967280 }
 0x365   :  { %1332 = vsyncpa [#allocation4], 1 }
 0x366   :  { %1333 = vsyncpa [#allocation7], 1 }
 0x367   :  { %1334 = vsyncpa [#allocation5], 1 }

</bundles_post_ra>
